<compile_context>
chip_gen: v5e
topology: v5e:2x2
jax: 0.10.0
libtpu: 0.0.40
codegen_flags: <defaults>
</compile_context>

<pallas_src>
import functools
import math

import jax
import jax.numpy as jnp
from jax import lax
from jax.experimental import pallas as pl
from jax.experimental.pallas import tpu as pltpu

_VMEM_LIMIT = 52 * 1024 * 1024  # ~20% headroom under v7x's 64 MiB physical VMEM


def _pick_tile(n, preferred):
    """Largest preferred tile that divides n (falls back to n for tiny dims)."""
    for t in preferred:
        if t <= n and n % t == 0:
            return t
    return n


# -----------------------------------------------------------------------------
# Kernel A: fused Q/K/V projection, one head per grid step, head-major outputs.
#   q is pre-scaled by 1/sqrt(D) and emitted bf16 in (B,H,T,D);
#   k/v are emitted both as bf16 (attention input) and as x.dtype (`present`)
#   directly in the stacked (2,B,H,T,D) layout -> no XLA transpose/stack later.
# -----------------------------------------------------------------------------
def _qkv_kernel(x_ref, wq_ref, wk_ref, wv_ref, bq_ref, bk_ref, bv_ref,
                q_ref, kv_ref, pres_ref, *, scale):
    xb = x_ref[0]                                                    # (tq_a, C) bf16
    q = jnp.dot(xb, wq_ref[0], preferred_element_type=jnp.float32) + bq_ref[0]
    q_ref[0, 0] = (q * scale).astype(q_ref.dtype)                    # pre-scaled q
    k = jnp.dot(xb, wk_ref[0], preferred_element_type=jnp.float32) + bk_ref[0]
    v = jnp.dot(xb, wv_ref[0], preferred_element_type=jnp.float32) + bv_ref[0]
    kv_ref[0, 0, 0] = k.astype(kv_ref.dtype)                         # bf16 K (attn)
    kv_ref[1, 0, 0] = v.astype(kv_ref.dtype)                         # bf16 V (attn)
    pres_ref[0, 0, 0] = k.astype(pres_ref.dtype)                     # present[0]
    pres_ref[1, 0, 0] = v.astype(pres_ref.dtype)                     # present[1]


# -----------------------------------------------------------------------------
# Kernel B: flash-style attention (online softmax over kv tiles) fused with the
#   output projection.  Grid = (q-tile, batch, head, kv-tile); the (1,tq,C)
#   lane-dense y block stays resident across (head, kv-tile) and accumulates
#   each head's contribution  ctx_h @ Wp[h*D:(h+1)*D, :].
# -----------------------------------------------------------------------------
def _flash_attn_proj_kernel(q_ref, k_ref, v_ref, wp_ref, bp_ref, y_ref,
                            m_sc, l_sc, acc_sc, *, exp_dtype):
    h = pl.program_id(2)
    ki = pl.program_id(3)

    @pl.when(ki == 0)
    def _():
        m_sc[...] = jnp.full(m_sc.shape, -jnp.inf, jnp.float32)
        l_sc[...] = jnp.zeros(l_sc.shape, jnp.float32)
        acc_sc[...] = jnp.zeros(acc_sc.shape, jnp.float32)

    qh = q_ref[0, 0]                     # (tq, D)  bf16, pre-scaled by 1/sqrt(D)
    kh = k_ref[0, 0, 0]                  # (tkv, D) bf16
    vh = v_ref[0, 0, 0]                  # (tkv, D) bf16

    # q @ k^T without materializing a transpose: contract the last axes.
    s = lax.dot_general(qh, kh, (((1,), (1,)), ((), ())),
                        preferred_element_type=jnp.float32)          # (tq, tkv)

    m_prev = m_sc[...]                                               # (tq, 1)
    m_new = jnp.maximum(m_prev, jnp.max(s, axis=-1, keepdims=True))
    alpha = jnp.exp(m_prev - m_new)
    # exp in bf16 (EUP is the binding slot on v6e/v7x with D=64); f32 accumulation.
    p = jnp.exp((s - m_new).astype(exp_dtype))                       # (tq, tkv)
    l_sc[...] = alpha * l_sc[...] + jnp.sum(p.astype(jnp.float32),
                                            axis=-1, keepdims=True)
    acc_sc[...] = alpha * acc_sc[...] + jnp.dot(
        p.astype(jnp.bfloat16), vh, preferred_element_type=jnp.float32)
    m_sc[...] = m_new

    @pl.when(ki == pl.num_programs(3) - 1)
    def _():
        inv_l = pl.reciprocal(l_sc[...], approx=True)                # EUP, ~free
        ctx = (acc_sc[...] * inv_l).astype(jnp.bfloat16)             # (tq, D)
        part = jnp.dot(ctx, wp_ref[...],
                       preferred_element_type=jnp.float32)           # (tq, C)

        @pl.when(h == 0)
        def _():
            y_ref[0] = (part + bp_ref[...]).astype(y_ref.dtype)      # bias once

        @pl.when(h != 0)
        def _():
            y_ref[0] = (y_ref[0].astype(jnp.float32) + part).astype(y_ref.dtype)


def causal_self_attention(x, params, n_head, *, exp_dtype=jnp.bfloat16):
    """x: (B, T, C).  Weights are (C_in, C_out) so y = x @ W + b.

    exp_dtype: softmax exp precision.  bf16 is best on v6e/v7x (bf16 EUP);
    use jnp.float32 on v5e (no bf16 EUP, memory-bound anyway).
    """
    B, T, C = x.shape
    H = n_head
    assert C % H == 0
    D = C // H
    scale = 1.0 / math.sqrt(D)

    # bf16 activations/weights for the MXU; biases stay f32 (added post-accum).
    x_bf = x.astype(jnp.bfloat16)

    # Pre-split the QKV weights per head: (C, C) -> (H, C, D).  This is a tiny
    # one-time O(C^2) layout op (weights would be stored this way in practice)
    # and keeps every Pallas block full-extent in its lane dimension.
    def _per_head_w(w):
        return w.reshape(C, H, D).transpose(1, 0, 2).astype(jnp.bfloat16)

    wq_h = _per_head_w(params["wq"])
    wk_h = _per_head_w(params["wk"])
    wv_h = _per_head_w(params["wv"])
    bq_h = params["bq"].reshape(H, 1, D).astype(jnp.float32)
    bk_h = params["bk"].reshape(H, 1, D).astype(jnp.float32)
    bv_h = params["bv"].reshape(H, 1, D).astype(jnp.float32)
    wp = params["wp"].astype(jnp.bfloat16)            # (C, C), row-tiled per head
    bp = params["bp"].reshape(1, C).astype(jnp.float32)

    # ---------------- Kernel A: Q/K/V projection (head-major outputs) --------
    tq_a = _pick_tile(T, (1024, 512, 256, 128, 64, 32, 16, 8))
    grid_a = (T // tq_a, B, H)            # head axis innermost -> x tile reused

    q_h, kv_bf, present = pl.pallas_call(
        functools.partial(_qkv_kernel, scale=scale),
        out_shape=(
            jax.ShapeDtypeStruct((B, H, T, D), jnp.bfloat16),   # pre-scaled q
            jax.ShapeDtypeStruct((2, B, H, T, D), jnp.bfloat16),  # bf16 K/V (attn)
            jax.ShapeDtypeStruct((2, B, H, T, D), x.dtype),       # `present` cache
        ),
        grid=grid_a,
        in_specs=[
            pl.BlockSpec((1, tq_a, C), lambda ti, b, h: (b, ti, 0)),
            pl.BlockSpec((1, C, D), lambda ti, b, h: (h, 0, 0)),
            pl.BlockSpec((1, C, D), lambda ti, b, h: (h, 0, 0)),
            pl.BlockSpec((1, C, D), lambda ti, b, h: (h, 0, 0)),
            pl.BlockSpec((1, 1, D), lambda ti, b, h: (h, 0, 0)),
            pl.BlockSpec((1, 1, D), lambda ti, b, h: (h, 0, 0)),
            pl.BlockSpec((1, 1, D), lambda ti, b, h: (h, 0, 0)),
        ],
        out_specs=(
            pl.BlockSpec((1, 1, tq_a, D), lambda ti, b, h: (b, h, ti, 0)),
            pl.BlockSpec((2, 1, 1, tq_a, D), lambda ti, b, h: (0, b, h, ti, 0)),
            pl.BlockSpec((2, 1, 1, tq_a, D), lambda ti, b, h: (0, b, h, ti, 0)),
        ),
        compiler_params=pltpu.CompilerParams(
            dimension_semantics=("parallel", "parallel", "arbitrary"),
            vmem_limit_bytes=_VMEM_LIMIT),
    )(x_bf, wq_h, wk_h, wv_h, bq_h, bk_h, bv_h)

    # ---------------- Kernel B: flash attention + output projection ----------
    tq = _pick_tile(T, (512, 256, 128, 64, 32, 16, 8))
    tkv = _pick_tile(T, (256, 128, 64, 32, 16, 8))
    grid_b = (T // tq, B, H, T // tkv)    # q-tile leading (megacore), kv last

    y = pl.pallas_call(
        functools.partial(_flash_attn_proj_kernel, exp_dtype=exp_dtype),
        out_shape=jax.ShapeDtypeStruct((B, T, C), x.dtype),
        grid=grid_b,
        in_specs=[
            pl.BlockSpec((1, 1, tq, D), lambda qi, b, h, ki: (b, h, qi, 0)),
            pl.BlockSpec((1, 1, 1, tkv, D), lambda qi, b, h, ki: (0, b, h, ki, 0)),
            pl.BlockSpec((1, 1, 1, tkv, D), lambda qi, b, h, ki: (1, b, h, ki, 0)),
            pl.BlockSpec((D, C), lambda qi, b, h, ki: (h, 0)),    # Wp rows of head h
            pl.BlockSpec((1, C), lambda qi, b, h, ki: (0, 0)),
        ],
        out_specs=pl.BlockSpec((1, tq, C), lambda qi, b, h, ki: (b, qi, 0)),
        scratch_shapes=[
            pltpu.VMEM((tq, 1), jnp.float32),    # running max (current head)
            pltpu.VMEM((tq, 1), jnp.float32),    # running sum
            pltpu.VMEM((tq, D), jnp.float32),    # unnormalized context
        ],
        compiler_params=pltpu.CompilerParams(
            dimension_semantics=("parallel", "parallel", "arbitrary", "arbitrary"),
            vmem_limit_bytes=_VMEM_LIMIT),
    )(q_h, kv_bf, kv_bf, wp, bp)

    return y, present


def _ref_forward(x, p, n_head):
    """Plain-JAX (f32) reference mirroring the PyTorch forward (eval mode)."""
    B, T, C = x.shape
    D = C // n_head
    q = (x @ p["wq"] + p["bq"]).reshape(B, T, n_head, D).transpose(0, 2, 1, 3)
    k = (x @ p["wk"] + p["bk"]).reshape(B, T, n_head, D).transpose(0, 2, 1, 3)
    v = (x @ p["wv"] + p["bv"]).reshape(B, T, n_head, D).transpose(0, 2, 1, 3)
    att = jnp.einsum("bhtd,bhsd->bhts", q, k) * (1.0 / math.sqrt(D))
    att = jax.nn.softmax(att, axis=-1)
    y = jnp.einsum("bhts,bhsd->bhtd", att, v)
    y = y.transpose(0, 2, 1, 3).reshape(B, T, C)
    y = y @ p["wp"] + p["bp"]
    present = jnp.stack([k, v])
    return y, present


if __name__ == "__main__":
    # Small but layout-representative shapes (T, C multiples of 128).
    B, T, C, n_head = 2, 128, 256, 4   # head_dim = 64

    key = jax.random.PRNGKey(0)
    ks = jax.random.split(key, 9)
    bound = 1.0 / math.sqrt(C)  # PyTorch nn.Linear default init range
    params = {
        "wq": jax.random.uniform(ks[0], (C, C), jnp.float32, -bound, bound),
        "wk": jax.random.uniform(ks[1], (C, C), jnp.float32, -bound, bound),
        "wv": jax.random.uniform(ks[2], (C, C), jnp.float32, -bound, bound),
        "wp": jax.random.uniform(ks[3], (C, C), jnp.float32, -bound, bound),
        "bq": jax.random.uniform(ks[4], (C,), jnp.float32, -bound, bound),
        "bk": jax.random.uniform(ks[5], (C,), jnp.float32, -bound, bound),
        "bv": jax.random.uniform(ks[6], (C,), jnp.float32, -bound, bound),
        "bp": jax.random.uniform(ks[7], (C,), jnp.float32, -bound, bound),
    }
    x = jax.random.normal(ks[8], (B, T, C), jnp.float32)

    y, present = causal_self_attention(x, params, n_head)
    jax.block_until_ready((y, present))

    y_ref, present_ref = _ref_forward(x, params, n_head)
    assert y.shape == (B, T, C)
    assert present.shape == (2, B, n_head, T, C // n_head)
    # bf16 MXU inputs + bf16 exp (f32 accumulation) vs f32 ref -> loose tol.
    assert jnp.allclose(y, y_ref, rtol=3e-2, atol=3e-2), \
        f"y mismatch, max abs err {jnp.max(jnp.abs(y - y_ref))}"
    assert jnp.allclose(present, present_ref, rtol=3e-2, atol=3e-2), \
        f"present mismatch, max abs err {jnp.max(jnp.abs(present - present_ref))}"

    print("KERNEL_OK")
</pallas_src>

<mosaic_0001>
module attributes {stable_mosaic.version = 11 : i64} {
  func.func @_qkv_kernel(%arg0: i32, %arg1: i32, %arg2: i32, %arg3: memref<1x128x256xbf16, #tpu.memory_space<vmem>>, %arg4: memref<1x256x64xbf16, #tpu.memory_space<vmem>>, %arg5: memref<1x256x64xbf16, #tpu.memory_space<vmem>>, %arg6: memref<1x256x64xbf16, #tpu.memory_space<vmem>>, %arg7: memref<1x1x64xf32, #tpu.memory_space<vmem>>, %arg8: memref<1x1x64xf32, #tpu.memory_space<vmem>>, %arg9: memref<1x1x64xf32, #tpu.memory_space<vmem>>, %arg10: memref<1x1x128x64xbf16, #tpu.memory_space<vmem>>, %arg11: memref<2x1x1x128x64xbf16, #tpu.memory_space<vmem>>, %arg12: memref<2x1x1x128x64xf32, #tpu.memory_space<vmem>>) attributes {dimension_semantics = [#tpu.dimension_semantics<parallel>, #tpu.dimension_semantics<parallel>, #tpu.dimension_semantics<arbitrary>], iteration_bounds = array<i64: 1, 2, 4>, scalar_prefetch = 0 : i64, scratch_operands = 0 : i64, tpu.core_type = #tpu.core_type<tc>, window_params = [{transform_indices = @transform_0, window_bounds = array<i64: 1, 128, 256>}, {transform_indices = @transform_1, window_bounds = array<i64: 1, 256, 64>}, {transform_indices = @transform_2, window_bounds = array<i64: 1, 256, 64>}, {transform_indices = @transform_3, window_bounds = array<i64: 1, 256, 64>}, {transform_indices = @transform_4, window_bounds = array<i64: 1, 1, 64>}, {transform_indices = @transform_5, window_bounds = array<i64: 1, 1, 64>}, {transform_indices = @transform_6, window_bounds = array<i64: 1, 1, 64>}, {transform_indices = @transform_7, window_bounds = array<i64: 1, 1, 128, 64>}, {transform_indices = @transform_8, window_bounds = array<i64: 2, 1, 1, 128, 64>}, {transform_indices = @transform_9, window_bounds = array<i64: 2, 1, 1, 128, 64>}]} {
    %c0 = arith.constant 0 : index
    %c0_0 = arith.constant 0 : index
    %c0_1 = arith.constant 0 : index
    %0 = vector.load %arg3[%c0, %c0_0, %c0_1] : memref<1x128x256xbf16, #tpu.memory_space<vmem>>, vector<1x128x256xbf16>
    %1 = vector.shape_cast %0 : vector<1x128x256xbf16> to vector<128x256xbf16>
    %c0_2 = arith.constant 0 : index
    %c0_3 = arith.constant 0 : index
    %c0_4 = arith.constant 0 : index
    %2 = vector.load %arg4[%c0_2, %c0_3, %c0_4] : memref<1x256x64xbf16, #tpu.memory_space<vmem>>, vector<1x256x64xbf16>
    %3 = vector.shape_cast %2 : vector<1x256x64xbf16> to vector<256x64xbf16>
    %cst = arith.constant dense<0.000000e+00> : vector<128x64xf32>
    %4 = tpu.matmul %1, %3, %cst {dimension_numbers = #tpu.dot_dimension_numbers<[1], [0], [0], [1], [0, 0, 1, 1], [], []>} : vector<128x256xbf16>, vector<256x64xbf16>, vector<128x64xf32> -> vector<128x64xf32>
    %c0_5 = arith.constant 0 : index
    %c0_6 = arith.constant 0 : index
    %c0_7 = arith.constant 0 : index
    %5 = vector.load %arg7[%c0_5, %c0_6, %c0_7] : memref<1x1x64xf32, #tpu.memory_space<vmem>>, vector<1x1x64xf32>
    %6 = vector.shape_cast %5 : vector<1x1x64xf32> to vector<1x64xf32>
    %7 = vector.broadcast %6 : vector<1x64xf32> to vector<128x64xf32>
    %8 = arith.addf %4, %7 : vector<128x64xf32>
    %cst_8 = arith.constant 1.250000e-01 : f32
    %9 = vector.broadcast %cst_8 : f32 to vector<128x64xf32>
    %10 = arith.mulf %8, %9 : vector<128x64xf32>
    %11 = arith.truncf %10 : vector<128x64xf32> to vector<128x64xbf16>
    %c0_9 = arith.constant 0 : index
    %c0_10 = arith.constant 0 : index
    %c0_11 = arith.constant 0 : index
    %c0_12 = arith.constant 0 : index
    %12 = vector.load %arg10[%c0_9, %c0_10, %c0_11, %c0_12] : memref<1x1x128x64xbf16, #tpu.memory_space<vmem>>, vector<1x1x128x64xbf16>
    %13 = vector.shape_cast %12 : vector<1x1x128x64xbf16> to vector<128x64xbf16>
    %14 = vector.shape_cast %11 : vector<128x64xbf16> to vector<1x1x128x64xbf16>
    tpu.vector_store %arg10[%c0_9, %c0_10, %c0_11, %c0_12], %14 {strides = array<i32>} : memref<1x1x128x64xbf16, #tpu.memory_space<vmem>>, vector<1x1x128x64xbf16>,
    %c0_13 = arith.constant 0 : index
    %c0_14 = arith.constant 0 : index
    %c0_15 = arith.constant 0 : index
    %15 = vector.load %arg5[%c0_13, %c0_14, %c0_15] : memref<1x256x64xbf16, #tpu.memory_space<vmem>>, vector<1x256x64xbf16>
    %16 = vector.shape_cast %15 : vector<1x256x64xbf16> to vector<256x64xbf16>
    %cst_16 = arith.constant dense<0.000000e+00> : vector<128x64xf32>
    %17 = tpu.matmul %1, %16, %cst_16 {dimension_numbers = #tpu.dot_dimension_numbers<[1], [0], [0], [1], [0, 0, 1, 1], [], []>} : vector<128x256xbf16>, vector<256x64xbf16>, vector<128x64xf32> -> vector<128x64xf32>
    %c0_17 = arith.constant 0 : index
    %c0_18 = arith.constant 0 : index
    %c0_19 = arith.constant 0 : index
    %18 = vector.load %arg8[%c0_17, %c0_18, %c0_19] : memref<1x1x64xf32, #tpu.memory_space<vmem>>, vector<1x1x64xf32>
    %19 = vector.shape_cast %18 : vector<1x1x64xf32> to vector<1x64xf32>
    %20 = vector.broadcast %19 : vector<1x64xf32> to vector<128x64xf32>
    %21 = arith.addf %17, %20 : vector<128x64xf32>
    %c0_20 = arith.constant 0 : index
    %c0_21 = arith.constant 0 : index
    %c0_22 = arith.constant 0 : index
    %22 = vector.load %arg6[%c0_20, %c0_21, %c0_22] : memref<1x256x64xbf16, #tpu.memory_space<vmem>>, vector<1x256x64xbf16>
    %23 = vector.shape_cast %22 : vector<1x256x64xbf16> to vector<256x64xbf16>
    %cst_23 = arith.constant dense<0.000000e+00> : vector<128x64xf32>
    %24 = tpu.matmul %1, %23, %cst_23 {dimension_numbers = #tpu.dot_dimension_numbers<[1], [0], [0], [1], [0, 0, 1, 1], [], []>} : vector<128x256xbf16>, vector<256x64xbf16>, vector<128x64xf32> -> vector<128x64xf32>
    %c0_24 = arith.constant 0 : index
    %c0_25 = arith.constant 0 : index
    %c0_26 = arith.constant 0 : index
    %25 = vector.load %arg9[%c0_24, %c0_25, %c0_26] : memref<1x1x64xf32, #tpu.memory_space<vmem>>, vector<1x1x64xf32>
    %26 = vector.shape_cast %25 : vector<1x1x64xf32> to vector<1x64xf32>
    %27 = vector.broadcast %26 : vector<1x64xf32> to vector<128x64xf32>
    %28 = arith.addf %24, %27 : vector<128x64xf32>
    %29 = arith.truncf %21 : vector<128x64xf32> to vector<128x64xbf16>
    %c0_27 = arith.constant 0 : index
    %c0_28 = arith.constant 0 : index
    %c0_29 = arith.constant 0 : index
    %c0_30 = arith.constant 0 : index
    %c0_31 = arith.constant 0 : index
    %30 = vector.load %arg11[%c0_27, %c0_28, %c0_29, %c0_30, %c0_31] : memref<2x1x1x128x64xbf16, #tpu.memory_space<vmem>>, vector<1x1x1x128x64xbf16>
    %31 = vector.shape_cast %30 : vector<1x1x1x128x64xbf16> to vector<128x64xbf16>
    %32 = vector.shape_cast %29 : vector<128x64xbf16> to vector<1x1x1x128x64xbf16>
    tpu.vector_store %arg11[%c0_27, %c0_28, %c0_29, %c0_30, %c0_31], %32 {strides = array<i32>} : memref<2x1x1x128x64xbf16, #tpu.memory_space<vmem>>, vector<1x1x1x128x64xbf16>,
    %33 = arith.truncf %28 : vector<128x64xf32> to vector<128x64xbf16>
    %c1 = arith.constant 1 : index
    %c0_32 = arith.constant 0 : index
    %c0_33 = arith.constant 0 : index
    %c0_34 = arith.constant 0 : index
    %c0_35 = arith.constant 0 : index
    %34 = vector.load %arg11[%c1, %c0_32, %c0_33, %c0_34, %c0_35] : memref<2x1x1x128x64xbf16, #tpu.memory_space<vmem>>, vector<1x1x1x128x64xbf16>
    %35 = vector.shape_cast %34 : vector<1x1x1x128x64xbf16> to vector<128x64xbf16>
    %36 = vector.shape_cast %33 : vector<128x64xbf16> to vector<1x1x1x128x64xbf16>
    tpu.vector_store %arg11[%c1, %c0_32, %c0_33, %c0_34, %c0_35], %36 {strides = array<i32>} : memref<2x1x1x128x64xbf16, #tpu.memory_space<vmem>>, vector<1x1x1x128x64xbf16>,
    %c0_36 = arith.constant 0 : index
    %c0_37 = arith.constant 0 : index
    %c0_38 = arith.constant 0 : index
    %c0_39 = arith.constant 0 : index
    %c0_40 = arith.constant 0 : index
    %37 = vector.load %arg12[%c0_36, %c0_37, %c0_38, %c0_39, %c0_40] : memref<2x1x1x128x64xf32, #tpu.memory_space<vmem>>, vector<1x1x1x128x64xf32>
    %38 = vector.shape_cast %37 : vector<1x1x1x128x64xf32> to vector<128x64xf32>
    %39 = vector.shape_cast %21 : vector<128x64xf32> to vector<1x1x1x128x64xf32>
    tpu.vector_store %arg12[%c0_36, %c0_37, %c0_38, %c0_39, %c0_40], %39 {strides = array<i32>} : memref<2x1x1x128x64xf32, #tpu.memory_space<vmem>>, vector<1x1x1x128x64xf32>,
    %c1_41 = arith.constant 1 : index
    %c0_42 = arith.constant 0 : index
    %c0_43 = arith.constant 0 : index
    %c0_44 = arith.constant 0 : index
    %c0_45 = arith.constant 0 : index
    %40 = vector.load %arg12[%c1_41, %c0_42, %c0_43, %c0_44, %c0_45] : memref<2x1x1x128x64xf32, #tpu.memory_space<vmem>>, vector<1x1x1x128x64xf32>
    %41 = vector.shape_cast %40 : vector<1x1x1x128x64xf32> to vector<128x64xf32>
    %42 = vector.shape_cast %28 : vector<128x64xf32> to vector<1x1x1x128x64xf32>
    tpu.vector_store %arg12[%c1_41, %c0_42, %c0_43, %c0_44, %c0_45], %42 {strides = array<i32>} : memref<2x1x1x128x64xf32, #tpu.memory_space<vmem>>, vector<1x1x1x128x64xf32>,
    return
  }
  func.func @transform_0(%arg0: i32, %arg1: i32, %arg2: i32) -> (i32, i32, i32) {
    %c0_i32 = arith.constant 0 : i32
    %c0_i32_0 = arith.constant 0 : i32
    return %arg1, %arg0, %c0_i32 : i32, i32, i32
  }
  func.func @transform_1(%arg0: i32, %arg1: i32, %arg2: i32) -> (i32, i32, i32) {
    %c0_i32 = arith.constant 0 : i32
    %c0_i32_0 = arith.constant 0 : i32
    %c0_i32_1 = arith.constant 0 : i32
    return %arg2, %c0_i32, %c0_i32_0 : i32, i32, i32
  }
  func.func @transform_2(%arg0: i32, %arg1: i32, %arg2: i32) -> (i32, i32, i32) {
    %c0_i32 = arith.constant 0 : i32
    %c0_i32_0 = arith.constant 0 : i32
    %c0_i32_1 = arith.constant 0 : i32
    return %arg2, %c0_i32, %c0_i32_0 : i32, i32, i32
  }
  func.func @transform_3(%arg0: i32, %arg1: i32, %arg2: i32) -> (i32, i32, i32) {
    %c0_i32 = arith.constant 0 : i32
    %c0_i32_0 = arith.constant 0 : i32
    %c0_i32_1 = arith.constant 0 : i32
    return %arg2, %c0_i32, %c0_i32_0 : i32, i32, i32
  }
  func.func @transform_4(%arg0: i32, %arg1: i32, %arg2: i32) -> (i32, i32, i32) {
    %c0_i32 = arith.constant 0 : i32
    %c0_i32_0 = arith.constant 0 : i32
    %c0_i32_1 = arith.constant 0 : i32
    return %arg2, %c0_i32, %c0_i32_0 : i32, i32, i32
  }
  func.func @transform_5(%arg0: i32, %arg1: i32, %arg2: i32) -> (i32, i32, i32) {
    %c0_i32 = arith.constant 0 : i32
    %c0_i32_0 = arith.constant 0 : i32
    %c0_i32_1 = arith.constant 0 : i32
    return %arg2, %c0_i32, %c0_i32_0 : i32, i32, i32
  }
  func.func @transform_6(%arg0: i32, %arg1: i32, %arg2: i32) -> (i32, i32, i32) {
    %c0_i32 = arith.constant 0 : i32
    %c0_i32_0 = arith.constant 0 : i32
    %c0_i32_1 = arith.constant 0 : i32
    return %arg2, %c0_i32, %c0_i32_0 : i32, i32, i32
  }
  func.func @transform_7(%arg0: i32, %arg1: i32, %arg2: i32) -> (i32, i32, i32, i32) {
    %c0_i32 = arith.constant 0 : i32
    %c0_i32_0 = arith.constant 0 : i32
    return %arg1, %arg2, %arg0, %c0_i32 : i32, i32, i32, i32
  }
  func.func @transform_8(%arg0: i32, %arg1: i32, %arg2: i32) -> (i32, i32, i32, i32, i32) {
    %c0_i32 = arith.constant 0 : i32
    %c0_i32_0 = arith.constant 0 : i32
    %c0_i32_1 = arith.constant 0 : i32
    return %c0_i32, %arg1, %arg2, %arg0, %c0_i32_0 : i32, i32, i32, i32, i32
  }
  func.func @transform_9(%arg0: i32, %arg1: i32, %arg2: i32) -> (i32, i32, i32, i32, i32) {
    %c0_i32 = arith.constant 0 : i32
    %c0_i32_0 = arith.constant 0 : i32
    %c0_i32_1 = arith.constant 0 : i32
    return %c0_i32, %arg1, %arg2, %arg0, %c0_i32_0 : i32, i32, i32, i32, i32
  }
}

</mosaic_0001>

<bundles_post_ra>
// kernel: tpu_custom_call.1
= control target key start
LH: loop header
LB: loop body
LE: loop exit
PB: predicated region body
PF: predicated region fallthrough
CT: control target
= control target key end

     0   :  { %s3211_s0 = inlined_call_operand.vmem [shape: bf16[2,128,256], index: 0, kind: input, shape index: {}]   ;;  %s3212_s1 = inlined_call_operand.vmem [shape: bf16[4,256,64], index: 1, kind: input, shape index: {}]   ;;  %s3213_s2 = inlined_call_operand.vmem [shape: bf16[4,256,64], index: 2, kind: input, shape index: {}]   ;;  %s3214_s3 = inlined_call_operand.vmem [shape: bf16[4,256,64], index: 3, kind: input, shape index: {}]   ;;  %s3215_s4 = inlined_call_operand.vmem [shape: f32[4,1,64], index: 4, kind: input, shape index: {}]   ;;  %s3216_s5 = inlined_call_operand.vmem [shape: f32[4,1,64], index: 5, kind: input, shape index: {}]   ;;  %s3217_s6 = inlined_call_operand.vmem [shape: f32[4,1,64], index: 6, kind: input, shape index: {}]   ;;  %s3218_s7 = inlined_call_operand.vmem [shape: bf16[2,4,128,64], index: 7, kind: output, shape index: {0}]   ;;  %s3219_s8 = inlined_call_operand.vmem [shape: bf16[2,2,4,128,64], index: 8, kind: output, shape index: {1}]   ;;  %s3220_s9 = inlined_call_operand.vmem [shape: f32[2,2,4,128,64], index: 9, kind: output, shape index: {2}]  }
   0x1   :  { %3221 = sst [smem:[#allocation4_spill]] %s3212_s1 }
   0x2   :  { %s2607_s30 = smov 0   ;;  %s2609_s10 = smov 0  }
   0x3   :  { %s2611_s11 = smov 0   ;;  %s2613_s12 = smov 0  }
   0x4   :  { %s2615_s13 = smov 0   ;;  %s2617_s14 = smov 0  }
   0x5   :  { %s2619_s15 = smov 0  }
   0x6 LB: > { %s32_s16 = sadd.s32 1, %s2547_s13  ;;  %s35_s17 = sadd.s32 1, %s2551_s14  ;;  %s2555_s15 = sphi %s2619_s15, %s20_s15   ;;  %s2551_s14 = sphi %s2617_s14, %s3229_s14   ;;  %s2547_s13 = sphi %s2615_s13, %s3228_s13   ;;  %s2543_s12 = sphi %s2613_s12, %s3227_s12   ;;  %s2539_s11 = sphi %s2611_s11, %s3226_s11   ;;  %s2535_s10 = sphi %s2609_s10, %s3225_s10   ;;  %s2531_s30 = sphi %s2607_s30, %s3224_s30  }
   0x7   : > { %p33_p0 = scmp.ge.s32.totalorder %s32_s16, 4  ;;  %s2042_s18 = sadd.s32 4294967295, %s2555_s15  }
   0x8   : > { %p274_p1 = scmp.ne.s32.totalorder %s2535_s10, %s2531_s30  ;;  %p275_p2 = scmp.eq.s32.totalorder %s2042_s18, 7 }
   0x9   : > { %s3231_s16 = smov (%p33_p0, %s32_s16), 0  ;;  %s3233_s17 = smov (!%p33_p0, %s35_s17), %s2551_s14 }
   0xa   : > { %s258_s19 = ssub.s32 %s2547_s13, %s3231_s16  ;;  %p37_p3 = scmp.ge.s32.totalorder %s3233_s17, 2 }
   0xb   : > { %p2046_p4 = scmp.ge.s32.totalorder %s2555_s15, 1  ;;  %p2653_p5 = por %p275_p2, %p274_p1 }
   0xc   : > { %p385_p6 = scmp.lt.s32.totalorder %s2555_s15, 9  ;;  %s3235_s17 = smov (%p37_p3, %s3233_s17), 0 }
   0xd   : > { %s257_s21 = ssub.s32 %s2551_s14, %s3235_s17  ;;  %s264_s23 = sadd.s32 1, %s2535_s10 }
   0xe   : > { %p386_p7 = pnand %p2046_p4, %p385_p6  ;;  %s259_s22 = sor.u32 %s258_s19, %s257_s21 }
   0xf   : > { %p262_p8 = scmp.eq.s32.totalorder %s259_s22, 0  ;;  %p477_p9 = scmp.lt.s32.totalorder (!%p386_p7), %s2539_s11, 3 }
  0x10   : > { %389 = sbr.rel (%p386_p7) target bundleno = 426 (0x1aa), region = 48  ;;  %s3223_s1 = sld [smem:[#allocation4_spill]] (!%p386_p7) }
  0x11   : > { %s2664_s24 = scalar_select %p262_p8, %s2535_s10, %s264_s23  }
  0x12   : > { %p467_p10 = scmp.lt.s32.totalorder (!%p386_p7), %s2543_s12, 1 }
  0x15   : > { %s2668_s25 = scalar_select %p477_p9, %s2539_s11, 3  ;;  %vm875_vm0 = vcmask 519168   ;;  %vm1417_vm1 = vcmask 523264  }
  0x16   : > { %s2691_s18 = scalar_select %p467_p10, %s2543_s12, 1 }
  0x17   : > { %s2671_s26 = sshll.u32 %s2668_s25, 7  ;;  %s494_s23 = scalar_lea.vmem %s3215_s4, %s2668_s25 }
  0x18   : > { %s2677_s29 = scalar_lea.vmem %s3223_s1, %s2671_s26  ;;  %s2358_s19 = sshll.u32 %s2691_s18, 7 }
  0x19   : > { %v2385_v0 = vld [vmem:[%s2677_s29 + $0x38] sm:$0xff]  ;;  %v2384_v2 = vld [vmem:[%s2677_s29 + $0x30] sm:$0xff]  ;;  %v2383_v4 = vld [vmem:[%s2677_s29 + $0x28] sm:$0xff]  ;;  %s2704_s1 = scalar_lea.vmem %s3211_s0, %s2358_s19  ;;  %s2715_s19 = scalar_lea.vmem %s3213_s2, %s2671_s26 }
  0x1a   : > { %v2393_v1 = vld [vmem:[%s2677_s29 + $0x78] sm:$0xff]  ;;  %745 = vmatpush.bf16.msra.mxu0 %v2385_v0  ;;  %2426 = vmatpush.bf16.msra.mxu2 %v2385_v0  ;;  %v2392_v3 = vld [vmem:[%s2677_s29 + $0x70] sm:$0xff]  ;;  %v2391_v5 = vld [vmem:[%s2677_s29 + $0x68] sm:$0xff]  ;;  %s2729_s28 = scalar_lea.vmem %s3214_s3, %s2671_s26  ;;  %s500_s21 = scalar_lea.vmem %s3217_s6, %s2668_s25 }
  0x1b   : > { %794 = vmatpush.bf16.msra.mxu1 %v2393_v1  ;;  %2434 = vmatpush.bf16.msra.mxu3 %v2393_v1  ;;  %v2382_v6 = vld [vmem:[%s2677_s29 + $0x20] sm:$0xff]  ;;  %v2381_v8 = vld [vmem:[%s2677_s29 + $0x18] sm:$0xff]  ;;  %v2380_v10 = vld [vmem:[%s2677_s29 + $0x10] sm:$0xff]  ;;  %s2058_s26 = sshll.u32 %s2691_s18, 6 }
  0x1c   : > { %v2390_v7 = vld [vmem:[%s2677_s29 + $0x60] sm:$0xff]  ;;  %v2389_v9 = vld [vmem:[%s2677_s29 + $0x58] sm:$0xff]  ;;  %v2388_v11 = vld [vmem:[%s2677_s29 + $0x50] sm:$0xff] }
  0x1d   : > { %v2379_v12 = vld [vmem:[%s2677_s29 + $0x8] sm:$0xff]  ;;  %v2378_v14 = vld [vmem:[%s2677_s29] sm:$0xff]  ;;  %v2401_v24 = vld [vmem:[%s2715_s19 + $0x38] sm:$0xff] }
  0x1e   : > { %746 = vmatpush.bf16.msra.mxu0 %v2384_v2  ;;  %2427 = vmatpush.bf16.msra.mxu2 %v2384_v2  ;;  %v2387_v13 = vld [vmem:[%s2677_s29 + $0x48] sm:$0xff]  ;;  %v2386_v15 = vld [vmem:[%s2677_s29 + $0x40] sm:$0xff]  ;;  %v2409_v25 = vld [vmem:[%s2715_s19 + $0x78] sm:$0xff]  ;;  %s497_s29 = scalar_lea.vmem %s3216_s5, %s2668_s25 }
  0x1f   : > { %795 = vmatpush.bf16.msra.mxu1 %v2392_v3  ;;  %2435 = vmatpush.bf16.msra.mxu3 %v2392_v3  ;;  %v2062_v16 = vld [vmem:[%s2704_s1] sm:$0xf]  ;;  %v2363_v17 = vld [vmem:[%s2704_s1 + $0x4] sm:$0xf0]  ;;  %v2362_v20 = vld [vmem:[%s2704_s1 + $0x4] sm:$0xf] }
  0x20   : > { %v2094_v18 = vld [vmem:[%s2704_s1 + $0x40] sm:$0xf]  ;;  %v2371_v19 = vld [vmem:[%s2704_s1 + $0x44] sm:$0xf0]  ;;  %v2064_v21 = vld [vmem:[%s2704_s1 + $0x8] sm:$0xf0]  ;;  %v2731_v26 = vor.u32 %v2363_v17, %v2062_v16 }
  0x21   : > { %v2370_v22 = vld [vmem:[%s2704_s1 + $0x44] sm:$0xf]  ;;  %v2096_v23 = vld [vmem:[%s2704_s1 + $0x48] sm:$0xf0]  ;;  %v2733_v27 = vor.u32 %v2371_v19, %v2094_v18  ;;  %v2735_v28 = vor.u32 %v2362_v20, %v2064_v21  ;;  %v2417_v30 = vld [vmem:[%s2729_s28 + $0x38] sm:$0xff] }
  0x22   : > { %747 = vmatpush.bf16.msra.mxu0 %v2383_v4  ;;  %2428 = vmatpush.bf16.msra.mxu2 %v2383_v4  ;;  %v2737_v29 = vor.u32 %v2370_v22, %v2096_v23  ;;  %v2425_v31 = vld [vmem:[%s2729_s28 + $0x78] sm:$0xff]  ;;  %v2400_v32 = vld [vmem:[%s2715_s19 + $0x30] sm:$0xff]  ;;  %v2399_v36 = vld [vmem:[%s2715_s19 + $0x28] sm:$0xff] }
  0x23   : > { %796 = vmatpush.bf16.msra.mxu1 %v2391_v5  ;;  %2436 = vmatpush.bf16.msra.mxu3 %v2391_v5  ;;  %v2408_v33 = vld [vmem:[%s2715_s19 + $0x70] sm:$0xff]  ;;  %v2407_v37 = vld [vmem:[%s2715_s19 + $0x68] sm:$0xff]  ;;  %v2398_v41 = vld [vmem:[%s2715_s19 + $0x20] sm:$0xff] }
  0x24   : > { %v2416_v34 = vld [vmem:[%s2729_s28 + $0x30] sm:$0xff]  ;;  %v2415_v38 = vld [vmem:[%s2729_s28 + $0x28] sm:$0xff]  ;;  %v2406_v42 = vld [vmem:[%s2715_s19 + $0x60] sm:$0xff] }
  0x25   : > { %v2424_v35 = vld [vmem:[%s2729_s28 + $0x70] sm:$0xff]  ;;  %v2423_v39 = vld [vmem:[%s2729_s28 + $0x68] sm:$0xff]  ;;  %v2365_v43 = vld [vmem:[%s2704_s1 + $0x14] sm:$0xf0] }
  0x26   : > { %748 = vmatpush.bf16.msra.mxu0 %v2382_v6  ;;  %2429 = vmatpush.bf16.msra.mxu2 %v2382_v6  ;;  %v2070_v40 = vld [vmem:[%s2704_s1 + $0x10] sm:$0xf]  ;;  %v2373_v45 = vld [vmem:[%s2704_s1 + $0x54] sm:$0xf0]  ;;  %v2364_v46 = vld [vmem:[%s2704_s1 + $0x14] sm:$0xf] }
  0x27   : > { %797 = vmatpush.bf16.msra.mxu1 %v2390_v7  ;;  %2437 = vmatpush.bf16.msra.mxu3 %v2390_v7  ;;  %v2102_v44 = vld [vmem:[%s2704_s1 + $0x50] sm:$0xf]  ;;  %v2072_v47 = vld [vmem:[%s2704_s1 + $0x18] sm:$0xf0]  ;;  %v2372_v48 = vld [vmem:[%s2704_s1 + $0x54] sm:$0xf]  ;;  %v2767_v54 = vor.u32 %v2365_v43, %v2070_v40 }
  0x28   : > { %v2104_v49 = vld [vmem:[%s2704_s1 + $0x58] sm:$0xf0]  ;;  %v2414_v50 = vld [vmem:[%s2729_s28 + $0x20] sm:$0xff]  ;;  %v2769_v55 = vor.u32 %v2373_v45, %v2102_v44  ;;  %v2771_v56 = vor.u32 %v2364_v46, %v2072_v47  ;;  %v2396_v60 = vld [vmem:[%s2715_s19 + $0x10] sm:$0xff] }
  0x29   : > { %v2422_v51 = vld [vmem:[%s2729_s28 + $0x60] sm:$0xff]  ;;  %v2397_v52 = vld [vmem:[%s2715_s19 + $0x18] sm:$0xff]  ;;  %v2773_v57 = vor.u32 %v2372_v48, %v2104_v49  ;;  %v2404_v61 = vld [vmem:[%s2715_s19 + $0x50] sm:$0xff] }
  0x2a   : > { %749 = vmatpush.bf16.msra.mxu0 %v2381_v8  ;;  %2430 = vmatpush.bf16.msra.mxu2 %v2381_v8  ;;  %v2405_v53 = vld [vmem:[%s2715_s19 + $0x58] sm:$0xff]  ;;  %v2412_v62 = vld [vmem:[%s2729_s28 + $0x10] sm:$0xff]  ;;  %v2395_v0 = vld [vmem:[%s2715_s19 + $0x8] sm:$0xff] }
  0x2b   : > { %798 = vmatpush.bf16.msra.mxu1 %v2389_v9  ;;  %2438 = vmatpush.bf16.msra.mxu3 %v2389_v9  ;;  %v2413_v58 = vld [vmem:[%s2729_s28 + $0x18] sm:$0xff]  ;;  %v2420_v63 = vld [vmem:[%s2729_s28 + $0x50] sm:$0xff]  ;;  %v2403_v1 = vld [vmem:[%s2715_s19 + $0x48] sm:$0xff] }
  0x2c   : > { %v2421_v59 = vld [vmem:[%s2729_s28 + $0x58] sm:$0xff]  ;;  %v2411_v2 = vld [vmem:[%s2729_s28 + $0x8] sm:$0xff]  ;;  %v2078_v4 = vld [vmem:[%s2704_s1 + $0x20] sm:$0xf] }
  0x2d   : > { %v2419_v3 = vld [vmem:[%s2729_s28 + $0x48] sm:$0xff]  ;;  %v2394_v5 = vld [vmem:[%s2715_s19] sm:$0xff]  ;;  %v2086_v20 = vld [vmem:[%s2704_s1 + $0x30] sm:$0xf] }
  0x2e   : > { %750 = vmatpush.bf16.msra.mxu0 %v2380_v10  ;;  %2431 = vmatpush.bf16.msra.mxu2 %v2380_v10  ;;  %v2402_v6 = vld [vmem:[%s2715_s19 + $0x40] sm:$0xff]  ;;  %v2367_v7 = vld [vmem:[%s2704_s1 + $0x24] sm:$0xf0]  ;;  %v2369_v21 = vld [vmem:[%s2704_s1 + $0x34] sm:$0xf0] }
  0x2f   : > { %799 = vmatpush.bf16.msra.mxu1 %v2388_v11  ;;  %2439 = vmatpush.bf16.msra.mxu3 %v2388_v11  ;;  %v2110_v8 = vld [vmem:[%s2704_s1 + $0x60] sm:$0xf]  ;;  %v2375_v9 = vld [vmem:[%s2704_s1 + $0x64] sm:$0xf0]  ;;  %v2366_v10 = vld [vmem:[%s2704_s1 + $0x24] sm:$0xf]  ;;  %v2079_v16 = vor.u32 %v2367_v7, %v2078_v4 }
  0x30   : > { %v2080_v11 = vld [vmem:[%s2704_s1 + $0x28] sm:$0xf0]  ;;  %v2801_v17 = vor.u32 %v2375_v9, %v2110_v8  ;;  %v2118_v22 = vld [vmem:[%s2704_s1 + $0x70] sm:$0xf]  ;;  %v2377_v23 = vld [vmem:[%s2704_s1 + $0x74] sm:$0xf0] }
  0x31   : > { %v2083_v18 = vor.u32 %v2366_v10, %v2080_v11 }
  0x32   : > { %751 = vmatpush.bf16.msra.mxu0 %v2379_v12  ;;  %2432 = vmatpush.bf16.msra.mxu2 %v2379_v12  ;;  %v2374_v12 = vld [vmem:[%s2704_s1 + $0x64] sm:$0xf] }
  0x33   : > { %800 = vmatpush.bf16.msra.mxu1 %v2387_v13  ;;  %2440 = vmatpush.bf16.msra.mxu3 %v2387_v13  ;;  %v2112_v13 = vld [vmem:[%s2704_s1 + $0x68] sm:$0xf0] }
  0x34   : > { %v2803_v19 = vor.u32 %v2374_v12, %v2112_v13 }
  0x36   : > { %752 = vmatpush.bf16.msra.mxu0 %v2378_v14  ;;  %2433 = vmatpush.bf16.msra.mxu2 %v2378_v14  ;;  %v2410_v14 = vld [vmem:[%s2729_s28] sm:$0xff] }
  0x37   : > { %801 = vmatpush.bf16.msra.mxu1 %v2386_v15  ;;  %2441 = vmatpush.bf16.msra.mxu3 %v2386_v15  ;;  %v2418_v15 = vld [vmem:[%s2729_s28 + $0x40] sm:$0xff]  ;;  %s457_s28 = sand.u32 1, %s2531_s30  }
  0x38   : > { %s2047_s30 = sshll.u32 %s457_s28, 7 }
  0x39   : > { %753 = vmatmul.bf16.vlgmr.msra.gmra.mxu0 %v2731_v26  ;;  %773 = vmatmul.bf16.vlgmr.msra.gmra.mxu2 %v2733_v27  ;;  %s2936_s27 = scalar_lea.vmem [#allocation2], %s2047_s30 }
  0x3a   : > { %1024 = vmatpush.bf16.msrb.mxu2 %v2401_v24  ;;  %802 = vmatmul.bf16.vlgmr.msra.gmra.mxu1 %v2735_v28  ;;  %v2368_v24 = vld [vmem:[%s2704_s1 + $0x34] sm:$0xf] }
  0x3b   : > { %1073 = vmatpush.bf16.msrb.mxu3 %v2409_v25  ;;  %1254 = vmatpush.bf16.msrb.mxu0 %v2417_v30  ;;  %v2088_v25 = vld [vmem:[%s2704_s1 + $0x38] sm:$0xf0]  ;;  %v2376_v30 = vld [vmem:[%s2704_s1 + $0x74] sm:$0xf] }
  0x3c   : > { %822 = vmatmul.bf16.vlgmr.msra.gmra.mxu3 %v2737_v29  ;;  %1303 = vmatpush.bf16.msrb.mxu1 %v2425_v31  ;;  %v2120_v31 = vld [vmem:[%s2704_s1 + $0x78] sm:$0xf0]  ;;  %s2057_s1 = sshll.u32 %s2668_s25, 4  ;;  %s2350_s25 = sshll.u32 (%p2653_p5), %s2539_s11, 4 }
  0x3d   : > { %s511_s22 = sadd.s32 %s2058_s26, %s2057_s1 }
  0x3e   : > { %1025 = vmatpush.bf16.msrb.mxu2 %v2400_v32  ;;  %v2087_v32 = vor.u32 %v2369_v21, %v2086_v20  ;;  %s2059_s19 = sshll.u32 %s511_s22, 2  ;;  %s2048_s22 = sshll.u32 %s457_s28, 8 }
  0x3f   : > { %1074 = vmatpush.bf16.msrb.mxu3 %v2408_v33  ;;  %1255 = vmatpush.bf16.msrb.mxu0 %v2416_v34  ;;  %v2815_v33 = vor.u32 %v2377_v23, %v2118_v22  ;;  %v2091_v34 = vor.u32 %v2368_v24, %v2088_v25  ;;  %s2854_s18 = scalar_lea.vmem %s3218_s7, %s2059_s19 }
  0x40   : > { %1304 = vmatpush.bf16.msrb.mxu1 %v2424_v35  ;;  %v2817_v35 = vor.u32 %v2376_v30, %v2120_v31 }
  0x42   : > { %1026 = vmatpush.bf16.msrb.mxu2 %v2399_v36 }
  0x43   : > { %1075 = vmatpush.bf16.msrb.mxu3 %v2407_v37  ;;  %1256 = vmatpush.bf16.msrb.mxu0 %v2415_v38 }
  0x44   : > { %1305 = vmatpush.bf16.msrb.mxu1 %v2423_v39 }
  0x46   : > { %1027 = vmatpush.bf16.msrb.mxu2 %v2398_v41 }
  0x47   : > { %1076 = vmatpush.bf16.msrb.mxu3 %v2406_v42  ;;  %1257 = vmatpush.bf16.msrb.mxu0 %v2414_v50 }
  0x48   : > { %1306 = vmatpush.bf16.msrb.mxu1 %v2422_v51 }
  0x49   : > { %758 = vmatmul.bf16.gmra.mxu0 %v2767_v54  ;;  %778 = vmatmul.bf16.gmra.mxu2 %v2769_v55 }
  0x4a   : > { %1028 = vmatpush.bf16.msrb.mxu2 %v2397_v52  ;;  %807 = vmatmul.bf16.gmra.mxu1 %v2771_v56 }
  0x4b   : > { %1077 = vmatpush.bf16.msrb.mxu3 %v2405_v53  ;;  %1258 = vmatpush.bf16.msrb.mxu0 %v2413_v58 }
  0x4c   : > { %827 = vmatmul.bf16.gmra.mxu3 %v2773_v57  ;;  %1307 = vmatpush.bf16.msrb.mxu1 %v2421_v59 }
  0x4e   : > { %1029 = vmatpush.bf16.msrb.mxu2 %v2396_v60 }
  0x4f   : > { %1078 = vmatpush.bf16.msrb.mxu3 %v2404_v61  ;;  %1259 = vmatpush.bf16.msrb.mxu0 %v2412_v62 }
  0x50   : > { %1308 = vmatpush.bf16.msrb.mxu1 %v2420_v63 }
  0x52   : > { %1030 = vmatpush.bf16.msrb.mxu2 %v2395_v0 }
  0x53   : > { %1079 = vmatpush.bf16.msrb.mxu3 %v2403_v1  ;;  %1260 = vmatpush.bf16.msrb.mxu0 %v2411_v2 }
  0x54   : > { %1309 = vmatpush.bf16.msrb.mxu1 %v2419_v3 }
  0x56   : > { %1031 = vmatpush.bf16.msrb.mxu2 %v2394_v5 }
  0x57   : > { %1080 = vmatpush.bf16.msrb.mxu3 %v2402_v6  ;;  %1261 = vmatpush.bf16.msrb.mxu0 %v2410_v14 }
  0x58   : > { %1310 = vmatpush.bf16.msrb.mxu1 %v2418_v15 }
  0x59   : > { %763 = vmatmul.bf16.gmra.mxu0 %v2079_v16  ;;  %783 = vmatmul.bf16.gmra.mxu2 %v2801_v17 }
  0x5a   : > { %812 = vmatmul.bf16.gmra.mxu1 %v2083_v18 }
  0x5c   : > { %832 = vmatmul.bf16.gmra.mxu3 %v2803_v19 }
  0x69   : > { %768 = vmatmul.bf16.gmra.mxu0 %v2087_v32  ;;  %788 = vmatmul.bf16.gmra.mxu2 %v2815_v33 }
  0x6a   : > { %817 = vmatmul.bf16.gmra.mxu1 %v2091_v34 }
  0x6c   : > { %837 = vmatmul.bf16.gmra.mxu3 %v2817_v35 }
  0x79   : > { %1032 = vmatmul.bf16.vlgmr.msrb.gmra.mxu2 %v2731_v26  ;;  %1262 = vmatmul.bf16.vlgmr.msrb.gmra.mxu0 %v2731_v26  ;;  %v2842_v26 = vld [vmem:[%s494_s23] ss:$0 sm:$0xff]  ;;  %s2929_s23 = scalar_lea.vmem [#allocation3], %s2048_s22 }
  0x7a   : > { %1311 = vmatmul.bf16.vlgmr.msrb.gmra.mxu1 %v2735_v28 }
  0x7c   : > { %1081 = vmatmul.bf16.vlgmr.msrb.gmra.mxu3 %v2735_v28 }
  0x89   : > { %1037 = vmatmul.bf16.gmra.mxu2 %v2767_v54  ;;  %1267 = vmatmul.bf16.gmra.mxu0 %v2767_v54 }
  0x8a   : > { %1316 = vmatmul.bf16.gmra.mxu1 %v2771_v56 }
  0x8c   : > { %1086 = vmatmul.bf16.gmra.mxu3 %v2771_v56 }
  0x99   : > { %1042 = vmatmul.bf16.gmra.mxu2 %v2079_v16  ;;  %1272 = vmatmul.bf16.gmra.mxu0 %v2079_v16 }
  0x9a   : > { %1321 = vmatmul.bf16.gmra.mxu1 %v2083_v18 }
  0x9c   : > { %1091 = vmatmul.bf16.gmra.mxu3 %v2083_v18 }
  0xa9   : > { %1047 = vmatmul.bf16.gmra.mxu2 %v2087_v32  ;;  %1277 = vmatmul.bf16.gmra.mxu0 %v2087_v32 }
  0xaa   : > { %1326 = vmatmul.bf16.gmra.mxu1 %v2091_v34 }
  0xac   : > { %1096 = vmatmul.bf16.gmra.mxu3 %v2091_v34 }
  0xb6   : > { %v754_v28 = vpop.f32.mrf.mxu0 }
  0xb7   : > { %v755_v36 = vadd.f32 %v2842_v26, %v754_v28  ;;  %v803_v37 = vpop.f32.mrf.mxu1 }
  0xb9   : > { %v804_v38 = vadd.f32 %v803_v37, %v755_v36  ;;  %1052 = vmatmul.bf16.gmra.mxu2 %v2733_v27  ;;  %1282 = vmatmul.bf16.gmra.mxu0 %v2733_v27 }
  0xba   : > { %1331 = vmatmul.bf16.gmra.mxu1 %v2737_v29 }
  0xbb   : > { %v843_v39 = vmul.f32 0.125, %v804_v38 }
  0xbc   : > { %1101 = vmatmul.bf16.gmra.mxu3 %v2737_v29  ;;  %v774_v40 = vpop.f32.mrf.mxu2 }
  0xbd   : > { %v859_v41 = vpack.c.bf16 %v843_v39, %v843_v39  ;;  %v775_v42 = vadd.f32 %v2842_v26, %v774_v40 }
  0xbe   : > { %v756_v27 = vpop.f32.mrf.mxu0 }
  0xbf   : > { %v823_v43 = vpop.f32.mrf.mxu3  ;;  %876 = vst.msk [vmem:[%s2854_s18] sm:$0xf] %vm875_vm0, %v859_v41  ;;  %v757_v29 = vadd.f32 %v2842_v26, %v756_v27  ;;  %v805_v45 = vpop.f32.mrf.mxu1 }
  0xc0   : > { %v824_v44 = vadd.f32 %v823_v43, %v775_v42 }
  0xc1   : > { %v806_v47 = vadd.f32 %v805_v45, %v757_v29 }
  0xc2   : > { %v851_v46 = vmul.f32 0.125, %v824_v44 }
  0xc3   : > { %v844_v49 = vmul.f32 0.125, %v806_v47 }
  0xc4   : > { %v867_v48 = vpack.c.bf16 %v851_v46, %v851_v46  ;;  %v776_v50 = vpop.f32.mrf.mxu2 }
  0xc5   : > { %v860_v51 = vpack.c.bf16 %v844_v49, %v844_v49  ;;  %v777_v52 = vadd.f32 %v2842_v26, %v776_v50 }
  0xc6   : > { %884 = vst.msk [vmem:[%s2854_s18 + $0x20] sm:$0xf] %vm875_vm0, %v867_v48  ;;  %v759_v54 = vpop.f32.mrf.mxu0 }
  0xc7   : > { %v825_v53 = vpop.f32.mrf.mxu3  ;;  %877 = vst.msk [vmem:[%s2854_s18 + $0x4] sm:$0xf] %vm875_vm0, %v860_v51  ;;  %v760_v58 = vadd.f32 %v2842_v26, %v759_v54  ;;  %v808_v59 = vpop.f32.mrf.mxu1 }
  0xc8   : > { %v826_v56 = vadd.f32 %v825_v53, %v777_v52 }
  0xc9   : > { %v809_v61 = vadd.f32 %v808_v59, %v760_v58  ;;  %1057 = vmatmul.bf16.gmra.mxu2 %v2769_v55  ;;  %1287 = vmatmul.bf16.gmra.mxu0 %v2769_v55 }
  0xca   : > { %v852_v60 = vmul.f32 0.125, %v826_v56  ;;  %1336 = vmatmul.bf16.gmra.mxu1 %v2773_v57 }
  0xcb   : > { %v845_v63 = vmul.f32 0.125, %v809_v61  ;;  %v2914_v61 = vld [vmem:[%s500_s21] ss:$0 sm:$0xff] }
  0xcc   : > { %1106 = vmatmul.bf16.gmra.mxu3 %v2773_v57  ;;  %v868_v62 = vpack.c.bf16 %v852_v60, %v852_v60  ;;  %v779_v0 = vpop.f32.mrf.mxu2 }
  0xcd   : > { %v861_v1 = vpack.c.bf16 %v845_v63, %v845_v63  ;;  %v780_v2 = vadd.f32 %v2842_v26, %v779_v0 }
  0xce   : > { %885 = vst.msk [vmem:[%s2854_s18 + $0x24] sm:$0xf] %vm875_vm0, %v868_v62  ;;  %v761_v4 = vpop.f32.mrf.mxu0 }
  0xcf   : > { %v828_v3 = vpop.f32.mrf.mxu3  ;;  %878 = vst.msk [vmem:[%s2854_s18 + $0x8] sm:$0xf] %vm875_vm0, %v861_v1  ;;  %v762_v55 = vadd.f32 %v2842_v26, %v761_v4  ;;  %v810_v6 = vpop.f32.mrf.mxu1 }
  0xd0   : > { %v829_v5 = vadd.f32 %v828_v3, %v780_v2 }
  0xd1   : > { %v811_v57 = vadd.f32 %v810_v6, %v762_v55 }
  0xd2   : > { %v853_v7 = vmul.f32 0.125, %v829_v5 }
  0xd3   : > { %v846_v9 = vmul.f32 0.125, %v811_v57 }
  0xd4   : > { %v869_v8 = vpack.c.bf16 %v853_v7, %v853_v7  ;;  %v781_v10 = vpop.f32.mrf.mxu2  ;;  %v2927_v7 = vld [vmem:[%s497_s29] ss:$0 sm:$0xff]  ;;  %s2351_s29 = sshll.u32 (%p2653_p5), %s2543_s12, 6 }
  0xd5   : > { %v862_v11 = vpack.c.bf16 %v846_v9, %v846_v9  ;;  %v782_v12 = vadd.f32 %v2842_v26, %v781_v10 }
  0xd6   : > { %886 = vst.msk [vmem:[%s2854_s18 + $0x28] sm:$0xf] %vm875_vm0, %v869_v8  ;;  %v764_v14 = vpop.f32.mrf.mxu0 }
  0xd7   : > { %v830_v13 = vpop.f32.mrf.mxu3  ;;  %879 = vst.msk [vmem:[%s2854_s18 + $0xc] sm:$0xf] %vm875_vm0, %v862_v11  ;;  %v765_v16 = vadd.f32 %v2842_v26, %v764_v14  ;;  %v813_v18 = vpop.f32.mrf.mxu1 }
  0xd8   : > { %v831_v15 = vadd.f32 %v830_v13, %v782_v12 }
  0xd9   : > { %v814_v21 = vadd.f32 %v813_v18, %v765_v16  ;;  %1062 = vmatmul.bf16.gmra.mxu2 %v2801_v17  ;;  %1292 = vmatmul.bf16.gmra.mxu0 %v2801_v17 }
  0xda   : > { %v854_v20 = vmul.f32 0.125, %v831_v15  ;;  %1341 = vmatmul.bf16.gmra.mxu1 %v2803_v19 }
  0xdb   : > { %v847_v23 = vmul.f32 0.125, %v814_v21 }
  0xdc   : > { %1111 = vmatmul.bf16.gmra.mxu3 %v2803_v19  ;;  %v870_v22 = vpack.c.bf16 %v854_v20, %v854_v20  ;;  %v784_v24 = vpop.f32.mrf.mxu2 }
  0xdd   : > { %v863_v25 = vpack.c.bf16 %v847_v23, %v847_v23  ;;  %v785_v30 = vadd.f32 %v2842_v26, %v784_v24 }
  0xde   : > { %887 = vst.msk [vmem:[%s2854_s18 + $0x2c] sm:$0xf] %vm875_vm0, %v870_v22  ;;  %v766_v32 = vpop.f32.mrf.mxu0 }
  0xdf   : > { %v833_v31 = vpop.f32.mrf.mxu3  ;;  %880 = vst.msk [vmem:[%s2854_s18 + $0x10] sm:$0xf] %vm875_vm0, %v863_v25  ;;  %v767_v17 = vadd.f32 %v2842_v26, %v766_v32  ;;  %v815_v28 = vpop.f32.mrf.mxu1 }
  0xe0   : > { %v834_v34 = vadd.f32 %v833_v31, %v785_v30 }
  0xe1   : > { %v816_v19 = vadd.f32 %v815_v28, %v767_v17 }
  0xe2   : > { %v855_v36 = vmul.f32 0.125, %v834_v34 }
  0xe3   : > { %v848_v38 = vmul.f32 0.125, %v816_v19 }
  0xe4   : > { %v871_v37 = vpack.c.bf16 %v855_v36, %v855_v36  ;;  %v786_v39 = vpop.f32.mrf.mxu2 }
  0xe5   : > { %v864_v40 = vpack.c.bf16 %v848_v38, %v848_v38  ;;  %v787_v41 = vadd.f32 %v2842_v26, %v786_v39 }
  0xe6   : > { %888 = vst.msk [vmem:[%s2854_s18 + $0x30] sm:$0xf] %vm875_vm0, %v871_v37  ;;  %v769_v43 = vpop.f32.mrf.mxu0 }
  0xe7   : > { %v835_v42 = vpop.f32.mrf.mxu3  ;;  %881 = vst.msk [vmem:[%s2854_s18 + $0x14] sm:$0xf] %vm875_vm0, %v864_v40  ;;  %v770_v44 = vadd.f32 %v2842_v26, %v769_v43  ;;  %v818_v29 = vpop.f32.mrf.mxu1 }
  0xe8   : > { %v836_v27 = vadd.f32 %v835_v42, %v787_v41 }
  0xe9   : > { %v819_v46 = vadd.f32 %v818_v29, %v770_v44  ;;  %1067 = vmatmul.bf16.gmra.mxu2 %v2815_v33  ;;  %1297 = vmatmul.bf16.gmra.mxu0 %v2815_v33 }
  0xea   : > { %v856_v45 = vmul.f32 0.125, %v836_v27  ;;  %1346 = vmatmul.bf16.gmra.mxu1 %v2817_v35 }
  0xeb   : > { %v849_v48 = vmul.f32 0.125, %v819_v46 }
  0xec   : > { %1116 = vmatmul.bf16.gmra.mxu3 %v2817_v35  ;;  %v872_v47 = vpack.c.bf16 %v856_v45, %v856_v45  ;;  %v789_v49 = vpop.f32.mrf.mxu2 }
  0xed   : > { %v865_v50 = vpack.c.bf16 %v849_v48, %v849_v48  ;;  %v790_v51 = vadd.f32 %v2842_v26, %v789_v49 }
  0xee   : > { %889 = vst.msk [vmem:[%s2854_s18 + $0x34] sm:$0xf] %vm875_vm0, %v872_v47  ;;  %v771_v53 = vpop.f32.mrf.mxu0 }
  0xef   : > { %v838_v52 = vpop.f32.mrf.mxu3  ;;  %882 = vst.msk [vmem:[%s2854_s18 + $0x18] sm:$0xf] %vm875_vm0, %v865_v50  ;;  %v772_v54 = vadd.f32 %v2842_v26, %v771_v53  ;;  %v820_v56 = vpop.f32.mrf.mxu1 }
  0xf0   : > { %v839_v33 = vadd.f32 %v838_v52, %v790_v51 }
  0xf1   : > { %v821_v58 = vadd.f32 %v820_v56, %v772_v54 }
  0xf2   : > { %v857_v35 = vmul.f32 0.125, %v839_v33 }
  0xf3   : > { %v850_v60 = vmul.f32 0.125, %v821_v58 }
  0xf4   : > { %v873_v59 = vpack.c.bf16 %v857_v35, %v857_v35  ;;  %v791_v62 = vpop.f32.mrf.mxu2 }
  0xf5   : > { %v866_v63 = vpack.c.bf16 %v850_v60, %v850_v60  ;;  %v792_v0 = vadd.f32 %v2842_v26, %v791_v62 }
  0xf6   : > { %890 = vst.msk [vmem:[%s2854_s18 + $0x38] sm:$0xf] %vm875_vm0, %v873_v59  ;;  %v1263_v2 = vpop.f32.mrf.mxu0 }
  0xf7   : > { %v840_v1 = vpop.f32.mrf.mxu3  ;;  %883 = vst.msk [vmem:[%s2854_s18 + $0x1c] sm:$0xf] %vm875_vm0, %v866_v63  ;;  %v1264_v4 = vadd.f32 %v2914_v61, %v1263_v2  ;;  %v1312_v5 = vpop.f32.mrf.mxu1 }
  0xf8   : > { %v841_v3 = vadd.f32 %v840_v1, %v792_v0 }
  0xf9   : > { %v1313_v6 = vadd.f32 %v1312_v5, %v1264_v4 }
  0xfa   : > { %v858_v55 = vmul.f32 0.125, %v841_v3 }
  0xfb   : > { %v1384_v57 = vpack.c.bf16 %v1313_v6, %v1313_v6  ;;  %2332 = vst.msk [vmem:[%s2929_s23 + $0x80] sm:$0xff] %vm1417_vm1, %v1313_v6 }
  0xfc   : > { %v874_v26 = vpack.c.bf16 %v858_v55, %v858_v55  ;;  %v1033_v8 = vpop.f32.mrf.mxu2 }
  0xfd   : > { %v1034_v9 = vadd.f32 %v2927_v7, %v1033_v8  ;;  %2316 = vst.msk [vmem:[%s2936_s27 + $0x40] sm:$0xf] %vm875_vm0, %v1384_v57 }
  0xfe   : > { %891 = vst.msk [vmem:[%s2854_s18 + $0x3c] sm:$0xf] %vm875_vm0, %v874_v26  ;;  %v1265_v11 = vpop.f32.mrf.mxu0  ;;  %s1483_s18 = sadd.s32 (%p2653_p5), %s2351_s29, %s2350_s25 }
  0xff   : > { %v1082_v10 = vpop.f32.mrf.mxu3  ;;  %v1266_v13 = vadd.f32 %v2914_v61, %v1265_v11  ;;  %v1314_v14 = vpop.f32.mrf.mxu1  ;;  %s2352_s28 = sshll.u32 (%p2653_p5), %s1483_s18, 2 }
 0x100   : > { %v1083_v12 = vadd.f32 %v1082_v10, %v1034_v9  ;;  %s1485_s22 = scalar_lea.vmem (%p2653_p5), %s3219_s8, %s2352_s28 }
 0x101   : > { %v1315_v16 = vadd.f32 %v1314_v14, %v1266_v13 }
 0x102   : > { %v1352_v15 = vpack.c.bf16 %v1083_v12, %v1083_v12  ;;  %1418 = vst.msk [vmem:[%s2929_s23] sm:$0xff] %vm1417_vm1, %v1083_v12 }
 0x103   : > { %v1385_v18 = vpack.c.bf16 %v1315_v16, %v1315_v16  ;;  %2333 = vst.msk [vmem:[%s2929_s23 + $0x88] sm:$0xff] %vm1417_vm1, %v1315_v16 }
 0x104   : > { %1368 = vst.msk [vmem:[%s2936_s27] sm:$0xf] %vm875_vm0, %v1352_v15  ;;  %v1035_v20 = vpop.f32.mrf.mxu2 }
 0x105   : > { %2317 = vst.msk [vmem:[%s2936_s27 + $0x44] sm:$0xf] %vm875_vm0, %v1385_v18  ;;  %v1036_v21 = vadd.f32 %v2927_v7, %v1035_v20 }
 0x106   : > { %v1268_v23 = vpop.f32.mrf.mxu0 }
 0x107   : > { %v1084_v22 = vpop.f32.mrf.mxu3  ;;  %v1269_v25 = vadd.f32 %v2914_v61, %v1268_v23  ;;  %v1317_v30 = vpop.f32.mrf.mxu1 }
 0x108   : > { %v1085_v24 = vadd.f32 %v1084_v22, %v1036_v21 }
 0x109   : > { %v1318_v32 = vadd.f32 %v1317_v30, %v1269_v25 }
 0x10a   : > { %v1353_v31 = vpack.c.bf16 %v1085_v24, %v1085_v24  ;;  %1419 = vst.msk [vmem:[%s2929_s23 + $0x8] sm:$0xff] %vm1417_vm1, %v1085_v24 }
 0x10b   : > { %v1386_v34 = vpack.c.bf16 %v1318_v32, %v1318_v32  ;;  %2334 = vst.msk [vmem:[%s2929_s23 + $0x90] sm:$0xff] %vm1417_vm1, %v1318_v32 }
 0x10c   : > { %1369 = vst.msk [vmem:[%s2936_s27 + $0x4] sm:$0xf] %vm875_vm0, %v1353_v31  ;;  %v1038_v17 = vpop.f32.mrf.mxu2 }
 0x10d   : > { %2318 = vst.msk [vmem:[%s2936_s27 + $0x48] sm:$0xf] %vm875_vm0, %v1386_v34  ;;  %v1039_v28 = vadd.f32 %v2927_v7, %v1038_v17 }
 0x10e   : > { %v1270_v19 = vpop.f32.mrf.mxu0 }
 0x10f   : > { %v1087_v36 = vpop.f32.mrf.mxu3  ;;  %v1271_v38 = vadd.f32 %v2914_v61, %v1270_v19  ;;  %v1319_v39 = vpop.f32.mrf.mxu1 }
 0x110   : > { %v1088_v37 = vadd.f32 %v1087_v36, %v1039_v28 }
 0x111   : > { %v1320_v41 = vadd.f32 %v1319_v39, %v1271_v38 }
 0x112   : > { %v1354_v40 = vpack.c.bf16 %v1088_v37, %v1088_v37  ;;  %1420 = vst.msk [vmem:[%s2929_s23 + $0x10] sm:$0xff] %vm1417_vm1, %v1088_v37 }
 0x113   : > { %v1387_v42 = vpack.c.bf16 %v1320_v41, %v1320_v41  ;;  %2335 = vst.msk [vmem:[%s2929_s23 + $0x98] sm:$0xff] %vm1417_vm1, %v1320_v41 }
 0x114   : > { %1370 = vst.msk [vmem:[%s2936_s27 + $0x8] sm:$0xf] %vm875_vm0, %v1354_v40  ;;  %v1040_v43 = vpop.f32.mrf.mxu2 }
 0x115   : > { %2319 = vst.msk [vmem:[%s2936_s27 + $0x4c] sm:$0xf] %vm875_vm0, %v1387_v42  ;;  %v1041_v27 = vadd.f32 %v2927_v7, %v1040_v43 }
 0x116   : > { %v1273_v29 = vpop.f32.mrf.mxu0 }
 0x117   : > { %v1089_v44 = vpop.f32.mrf.mxu3  ;;  %v1274_v46 = vadd.f32 %v2914_v61, %v1273_v29  ;;  %v1322_v47 = vpop.f32.mrf.mxu1 }
 0x118   : > { %v1090_v45 = vadd.f32 %v1089_v44, %v1041_v27 }
 0x119   : > { %v1323_v49 = vadd.f32 %v1322_v47, %v1274_v46 }
 0x11a   : > { %v1355_v48 = vpack.c.bf16 %v1090_v45, %v1090_v45  ;;  %1421 = vst.msk [vmem:[%s2929_s23 + $0x18] sm:$0xff] %vm1417_vm1, %v1090_v45 }
 0x11b   : > { %v1388_v50 = vpack.c.bf16 %v1323_v49, %v1323_v49  ;;  %2336 = vst.msk [vmem:[%s2929_s23 + $0xa0] sm:$0xff] %vm1417_vm1, %v1323_v49 }
 0x11c   : > { %1371 = vst.msk [vmem:[%s2936_s27 + $0xc] sm:$0xf] %vm875_vm0, %v1355_v48  ;;  %v1043_v51 = vpop.f32.mrf.mxu2 }
 0x11d   : > { %2320 = vst.msk [vmem:[%s2936_s27 + $0x50] sm:$0xf] %vm875_vm0, %v1388_v50  ;;  %v1044_v52 = vadd.f32 %v2927_v7, %v1043_v51 }
 0x11e   : > { %v1275_v33 = vpop.f32.mrf.mxu0 }
 0x11f   : > { %v1092_v53 = vpop.f32.mrf.mxu3  ;;  %v1276_v56 = vadd.f32 %v2914_v61, %v1275_v33  ;;  %v1324_v35 = vpop.f32.mrf.mxu1 }
 0x120   : > { %v1093_v54 = vadd.f32 %v1092_v53, %v1044_v52 }
 0x121   : > { %v1325_v59 = vadd.f32 %v1324_v35, %v1276_v56 }
 0x122   : > { %v1356_v58 = vpack.c.bf16 %v1093_v54, %v1093_v54  ;;  %1422 = vst.msk [vmem:[%s2929_s23 + $0x20] sm:$0xff] %vm1417_vm1, %v1093_v54 }
 0x123   : > { %v1389_v60 = vpack.c.bf16 %v1325_v59, %v1325_v59  ;;  %2337 = vst.msk [vmem:[%s2929_s23 + $0xa8] sm:$0xff] %vm1417_vm1, %v1325_v59 }
 0x124   : > { %1372 = vst.msk [vmem:[%s2936_s27 + $0x10] sm:$0xf] %vm875_vm0, %v1356_v58  ;;  %v1045_v62 = vpop.f32.mrf.mxu2 }
 0x125   : > { %2321 = vst.msk [vmem:[%s2936_s27 + $0x54] sm:$0xf] %vm875_vm0, %v1389_v60  ;;  %v1046_v63 = vadd.f32 %v2927_v7, %v1045_v62 }
 0x126   : > { %v1278_v1 = vpop.f32.mrf.mxu0 }
 0x127   : > { %v1094_v0 = vpop.f32.mrf.mxu3  ;;  %v1279_v3 = vadd.f32 %v2914_v61, %v1278_v1  ;;  %v1327_v4 = vpop.f32.mrf.mxu1 }
 0x128   : > { %v1095_v2 = vadd.f32 %v1094_v0, %v1046_v63 }
 0x129   : > { %v1328_v55 = vadd.f32 %v1327_v4, %v1279_v3 }
 0x12a   : > { %v1357_v5 = vpack.c.bf16 %v1095_v2, %v1095_v2  ;;  %1423 = vst.msk [vmem:[%s2929_s23 + $0x28] sm:$0xff] %vm1417_vm1, %v1095_v2 }
 0x12b   : > { %v1390_v6 = vpack.c.bf16 %v1328_v55, %v1328_v55  ;;  %2338 = vst.msk [vmem:[%s2929_s23 + $0xb0] sm:$0xff] %vm1417_vm1, %v1328_v55 }
 0x12c   : > { %1373 = vst.msk [vmem:[%s2936_s27 + $0x14] sm:$0xf] %vm875_vm0, %v1357_v5  ;;  %v1048_v26 = vpop.f32.mrf.mxu2 }
 0x12d   : > { %2322 = vst.msk [vmem:[%s2936_s27 + $0x58] sm:$0xf] %vm875_vm0, %v1390_v6  ;;  %v1049_v57 = vadd.f32 %v2927_v7, %v1048_v26 }
 0x12e   : > { %v1280_v9 = vpop.f32.mrf.mxu0 }
 0x12f   : > { %v1097_v8 = vpop.f32.mrf.mxu3  ;;  %v1281_v11 = vadd.f32 %v2914_v61, %v1280_v9  ;;  %v1329_v12 = vpop.f32.mrf.mxu1 }
 0x130   : > { %v1098_v10 = vadd.f32 %v1097_v8, %v1049_v57 }
 0x131   : > { %v1330_v14 = vadd.f32 %v1329_v12, %v1281_v11 }
 0x132   : > { %v1358_v13 = vpack.c.bf16 %v1098_v10, %v1098_v10  ;;  %1424 = vst.msk [vmem:[%s2929_s23 + $0x30] sm:$0xff] %vm1417_vm1, %v1098_v10 }
 0x133   : > { %v1391_v15 = vpack.c.bf16 %v1330_v14, %v1330_v14  ;;  %2339 = vst.msk [vmem:[%s2929_s23 + $0xb8] sm:$0xff] %vm1417_vm1, %v1330_v14 }
 0x134   : > { %1374 = vst.msk [vmem:[%s2936_s27 + $0x18] sm:$0xf] %vm875_vm0, %v1358_v13  ;;  %v1050_v16 = vpop.f32.mrf.mxu2 }
 0x135   : > { %2323 = vst.msk [vmem:[%s2936_s27 + $0x5c] sm:$0xf] %vm875_vm0, %v1391_v15  ;;  %v1051_v18 = vadd.f32 %v2927_v7, %v1050_v16 }
 0x136   : > { %v1283_v21 = vpop.f32.mrf.mxu0 }
 0x137   : > { %v1099_v20 = vpop.f32.mrf.mxu3  ;;  %v1284_v23 = vadd.f32 %v2914_v61, %v1283_v21  ;;  %v1332_v24 = vpop.f32.mrf.mxu1 }
 0x138   : > { %v1100_v22 = vadd.f32 %v1099_v20, %v1051_v18 }
 0x139   : > { %v1333_v30 = vadd.f32 %v1332_v24, %v1284_v23 }
 0x13a   : > { %v1359_v25 = vpack.c.bf16 %v1100_v22, %v1100_v22  ;;  %1425 = vst.msk [vmem:[%s2929_s23 + $0x38] sm:$0xff] %vm1417_vm1, %v1100_v22 }
 0x13b   : > { %v1392_v31 = vpack.c.bf16 %v1333_v30, %v1333_v30  ;;  %2340 = vst.msk [vmem:[%s2929_s23 + $0xc0] sm:$0xff] %vm1417_vm1, %v1333_v30 }
 0x13c   : > { %1375 = vst.msk [vmem:[%s2936_s27 + $0x1c] sm:$0xf] %vm875_vm0, %v1359_v25  ;;  %v1053_v32 = vpop.f32.mrf.mxu2 }
 0x13d   : > { %2324 = vst.msk [vmem:[%s2936_s27 + $0x60] sm:$0xf] %vm875_vm0, %v1392_v31  ;;  %v1054_v34 = vadd.f32 %v2927_v7, %v1053_v32 }
 0x13e   : > { %v1285_v28 = vpop.f32.mrf.mxu0 }
 0x13f   : > { %v1102_v17 = vpop.f32.mrf.mxu3  ;;  %v1286_v19 = vadd.f32 %v2914_v61, %v1285_v28  ;;  %v1334_v37 = vpop.f32.mrf.mxu1 }
 0x140   : > { %v1103_v36 = vadd.f32 %v1102_v17, %v1054_v34 }
 0x141   : > { %v1335_v39 = vadd.f32 %v1334_v37, %v1286_v19 }
 0x142   : > { %v1360_v38 = vpack.c.bf16 %v1103_v36, %v1103_v36  ;;  %1426 = vst.msk [vmem:[%s2929_s23 + $0x40] sm:$0xff] %vm1417_vm1, %v1103_v36 }
 0x143   : > { %v1393_v40 = vpack.c.bf16 %v1335_v39, %v1335_v39  ;;  %2341 = vst.msk [vmem:[%s2929_s23 + $0xc8] sm:$0xff] %vm1417_vm1, %v1335_v39 }
 0x144   : > { %1376 = vst.msk [vmem:[%s2936_s27 + $0x20] sm:$0xf] %vm875_vm0, %v1360_v38  ;;  %v1055_v41 = vpop.f32.mrf.mxu2 }
 0x145   : > { %2325 = vst.msk [vmem:[%s2936_s27 + $0x64] sm:$0xf] %vm875_vm0, %v1393_v40  ;;  %v1056_v42 = vadd.f32 %v2927_v7, %v1055_v41 }
 0x146   : > { %v1288_v27 = vpop.f32.mrf.mxu0 }
 0x147   : > { %v1104_v43 = vpop.f32.mrf.mxu3  ;;  %v1289_v29 = vadd.f32 %v2914_v61, %v1288_v27  ;;  %v1337_v45 = vpop.f32.mrf.mxu1  ;;  %v1510_v27 = vld [vmem:[%s2936_s27 + $0x10] sm:$0xff] (%p2653_p5)  }
 0x148   : > { %v1105_v44 = vadd.f32 %v1104_v43, %v1056_v42  ;;  %1511 = vst [vmem:[%s1485_s22 + $0x10] sm:$0xff] (%p2653_p5), %v1510_v27  }
 0x149   : > { %v1338_v47 = vadd.f32 %v1337_v45, %v1289_v29 }
 0x14a   : > { %v1361_v46 = vpack.c.bf16 %v1105_v44, %v1105_v44  ;;  %1427 = vst.msk [vmem:[%s2929_s23 + $0x48] sm:$0xff] %vm1417_vm1, %v1105_v44  ;;  %v1514_v44 = vld [vmem:[%s2936_s27 + $0x18] sm:$0xff] (%p2653_p5)  }
 0x14b   : > { %v1394_v48 = vpack.c.bf16 %v1338_v47, %v1338_v47  ;;  %2342 = vst.msk [vmem:[%s2929_s23 + $0xd0] sm:$0xff] %vm1417_vm1, %v1338_v47 }
 0x14c   : > { %1377 = vst.msk [vmem:[%s2936_s27 + $0x24] sm:$0xf] %vm875_vm0, %v1361_v46  ;;  %v1058_v49 = vpop.f32.mrf.mxu2 }
 0x14d   : > { %2326 = vst.msk [vmem:[%s2936_s27 + $0x68] sm:$0xf] %vm875_vm0, %v1394_v48  ;;  %v1059_v50 = vadd.f32 %v2927_v7, %v1058_v49  ;;  %v1534_v48 = vld [vmem:[%s2936_s27 + $0x40] sm:$0xff] (%p2653_p5)   ;;  %v1538_v49 = vld [vmem:[%s2936_s27 + $0x48] sm:$0xff] (%p2653_p5)  }
 0x14e   : > { %v1290_v52 = vpop.f32.mrf.mxu0  ;;  %1515 = vst [vmem:[%s1485_s22 + $0x18] sm:$0xff] (%p2653_p5), %v1514_v44  }
 0x14f   : > { %v1107_v51 = vpop.f32.mrf.mxu3  ;;  %v1291_v33 = vadd.f32 %v2914_v61, %v1290_v52  ;;  %v1339_v54 = vpop.f32.mrf.mxu1  ;;  %1535 = vst [vmem:[%s1485_s22 + $0x200] sm:$0xff] (%p2653_p5), %v1534_v48   ;;  %v1550_v52 = vld [vmem:[%s2936_s27 + $0x60] sm:$0xff] (%p2653_p5)  }
 0x150   : > { %v1108_v53 = vadd.f32 %v1107_v51, %v1059_v50  ;;  %v1542_v50 = vld [vmem:[%s2936_s27 + $0x50] sm:$0xff] (%p2653_p5)   ;;  %v1546_v51 = vld [vmem:[%s2936_s27 + $0x58] sm:$0xff] (%p2653_p5)   ;;  %1539 = vst [vmem:[%s1485_s22 + $0x208] sm:$0xff] (%p2653_p5), %v1538_v49  }
 0x151   : > { %v1340_v35 = vadd.f32 %v1339_v54, %v1291_v33  ;;  %1543 = vst [vmem:[%s1485_s22 + $0x210] sm:$0xff] (%p2653_p5), %v1542_v50  }
 0x152   : > { %v1362_v56 = vpack.c.bf16 %v1108_v53, %v1108_v53  ;;  %1428 = vst.msk [vmem:[%s2929_s23 + $0x50] sm:$0xff] %vm1417_vm1, %v1108_v53 }
 0x153   : > { %v1395_v58 = vpack.c.bf16 %v1340_v35, %v1340_v35  ;;  %2343 = vst.msk [vmem:[%s2929_s23 + $0xd8] sm:$0xff] %vm1417_vm1, %v1340_v35  ;;  %v1518_v29 = vld [vmem:[%s2936_s27 + $0x20] sm:$0xff] (%p2653_p5)  }
 0x154   : > { %1378 = vst.msk [vmem:[%s2936_s27 + $0x28] sm:$0xf] %vm875_vm0, %v1362_v56  ;;  %v1060_v59 = vpop.f32.mrf.mxu2 }
 0x155   : > { %2327 = vst.msk [vmem:[%s2936_s27 + $0x6c] sm:$0xf] %vm875_vm0, %v1395_v58  ;;  %v1061_v60 = vadd.f32 %v2927_v7, %v1060_v59 }
 0x156   : > { %v1293_v63 = vpop.f32.mrf.mxu0  ;;  %1519 = vst [vmem:[%s1485_s22 + $0x20] sm:$0xff] (%p2653_p5), %v1518_v29  }
 0x157   : > { %v1109_v62 = vpop.f32.mrf.mxu3  ;;  %v1294_v1 = vadd.f32 %v2914_v61, %v1293_v63  ;;  %v1342_v2 = vpop.f32.mrf.mxu1  ;;  %1547 = vst [vmem:[%s1485_s22 + $0x218] sm:$0xff] (%p2653_p5), %v1546_v51  }
 0x158   : > { %v1110_v0 = vadd.f32 %v1109_v62, %v1061_v60  ;;  %1551 = vst [vmem:[%s1485_s22 + $0x220] sm:$0xff] (%p2653_p5), %v1550_v52  }
 0x159   : > { %v1343_v4 = vadd.f32 %v1342_v2, %v1294_v1 }
 0x15a   : > { %v1363_v3 = vpack.c.bf16 %v1110_v0, %v1110_v0  ;;  %1429 = vst.msk [vmem:[%s2929_s23 + $0x58] sm:$0xff] %vm1417_vm1, %v1110_v0 }
 0x15b   : > { %v1396_v5 = vpack.c.bf16 %v1343_v4, %v1343_v4  ;;  %2344 = vst.msk [vmem:[%s2929_s23 + $0xe0] sm:$0xff] %vm1417_vm1, %v1343_v4 }
 0x15c   : > { %1379 = vst.msk [vmem:[%s2936_s27 + $0x2c] sm:$0xf] %vm875_vm0, %v1363_v3  ;;  %v1063_v55 = vpop.f32.mrf.mxu2  ;;  %v1554_v53 = vld [vmem:[%s2936_s27 + $0x68] sm:$0xff] (%p2653_p5)  }
 0x15d   : > { %2328 = vst.msk [vmem:[%s2936_s27 + $0x70] sm:$0xf] %vm875_vm0, %v1396_v5  ;;  %v1064_v6 = vadd.f32 %v2927_v7, %v1063_v55 }
 0x15e   : > { %v1295_v57 = vpop.f32.mrf.mxu0  ;;  %1555 = vst [vmem:[%s1485_s22 + $0x228] sm:$0xff] (%p2653_p5), %v1554_v53  }
 0x15f   : > { %v1112_v26 = vpop.f32.mrf.mxu3  ;;  %v1296_v9 = vadd.f32 %v2914_v61, %v1295_v57  ;;  %v1344_v10 = vpop.f32.mrf.mxu1 }
 0x160   : > { %v1113_v8 = vadd.f32 %v1112_v26, %v1064_v6 }
 0x161   : > { %v1345_v12 = vadd.f32 %v1344_v10, %v1296_v9 }
 0x162   : > { %v1364_v11 = vpack.c.bf16 %v1113_v8, %v1113_v8  ;;  %1430 = vst.msk [vmem:[%s2929_s23 + $0x60] sm:$0xff] %vm1417_vm1, %v1113_v8 }
 0x163   : > { %v1397_v13 = vpack.c.bf16 %v1345_v12, %v1345_v12  ;;  %2345 = vst.msk [vmem:[%s2929_s23 + $0xe8] sm:$0xff] %vm1417_vm1, %v1345_v12  ;;  %v1522_v45 = vld [vmem:[%s2936_s27 + $0x28] sm:$0xff] (%p2653_p5)  }
 0x164   : > { %1380 = vst.msk [vmem:[%s2936_s27 + $0x30] sm:$0xf] %vm875_vm0, %v1364_v11  ;;  %v1065_v14 = vpop.f32.mrf.mxu2 }
 0x165   : > { %2329 = vst.msk [vmem:[%s2936_s27 + $0x74] sm:$0xf] %vm875_vm0, %v1397_v13  ;;  %v1066_v15 = vadd.f32 %v2927_v7, %v1065_v14 }
 0x166   : > { %v1298_v18 = vpop.f32.mrf.mxu0  ;;  %1523 = vst [vmem:[%s1485_s22 + $0x28] sm:$0xff] (%p2653_p5), %v1522_v45  }
 0x167   : > { %v1114_v16 = vpop.f32.mrf.mxu3  ;;  %v1299_v21 = vadd.f32 %v2914_v61, %v1298_v18  ;;  %v1347_v22 = vpop.f32.mrf.mxu1 }
 0x168   : > { %v1115_v20 = vadd.f32 %v1114_v16, %v1066_v15 }
 0x169   : > { %v1348_v24 = vadd.f32 %v1347_v22, %v1299_v21 }
 0x16a   : > { %v1365_v23 = vpack.c.bf16 %v1115_v20, %v1115_v20  ;;  %1431 = vst.msk [vmem:[%s2929_s23 + $0x68] sm:$0xff] %vm1417_vm1, %v1115_v20 }
 0x16b   : > { %v1398_v25 = vpack.c.bf16 %v1348_v24, %v1348_v24  ;;  %2346 = vst.msk [vmem:[%s2929_s23 + $0xf0] sm:$0xff] %vm1417_vm1, %v1348_v24 }
 0x16c   : > { %1381 = vst.msk [vmem:[%s2936_s27 + $0x34] sm:$0xf] %vm875_vm0, %v1365_v23  ;;  %v1068_v30 = vpop.f32.mrf.mxu2  ;;  %v1558_v33 = vld [vmem:[%s2936_s27 + $0x70] sm:$0xff] (%p2653_p5)  }
 0x16d   : > { %2330 = vst.msk [vmem:[%s2936_s27 + $0x78] sm:$0xf] %vm875_vm0, %v1398_v25  ;;  %v1069_v31 = vadd.f32 %v2927_v7, %v1068_v30 }
 0x16e   : > { %v1300_v34 = vpop.f32.mrf.mxu0  ;;  %1559 = vst [vmem:[%s1485_s22 + $0x230] sm:$0xff] (%p2653_p5), %v1558_v33  }
 0x16f   : > { %v1117_v32 = vpop.f32.mrf.mxu3  ;;  %v1301_v28 = vadd.f32 %v2914_v61, %v1300_v34  ;;  %v1349_v36 = vpop.f32.mrf.mxu1  ;;  %v1502_v61 = vld [vmem:[%s2936_s27] sm:$0xff] (%p2653_p5)  }
 0x170   : > { %v1118_v17 = vadd.f32 %v1117_v32, %v1069_v31  ;;  %1503 = vst [vmem:[%s1485_s22] sm:$0xff] (%p2653_p5), %v1502_v61  }
 0x171   : > { %v1350_v37 = vadd.f32 %v1349_v36, %v1301_v28 }
 0x172   : > { %v1366_v19 = vpack.c.bf16 %v1118_v17, %v1118_v17  ;;  %1432 = vst.msk [vmem:[%s2929_s23 + $0x70] sm:$0xff] %vm1417_vm1, %v1118_v17 }
 0x173   : > { %v1399_v38 = vpack.c.bf16 %v1350_v37, %v1350_v37  ;;  %2347 = vst.msk [vmem:[%s2929_s23 + $0xf8] sm:$0xff] %vm1417_vm1, %v1350_v37  ;;  %v1526_v46 = vld [vmem:[%s2936_s27 + $0x30] sm:$0xff] (%p2653_p5)  }
 0x174   : > { %1382 = vst.msk [vmem:[%s2936_s27 + $0x38] sm:$0xf] %vm875_vm0, %v1366_v19  ;;  %v1070_v39 = vpop.f32.mrf.mxu2 }
 0x175   : > { %2331 = vst.msk [vmem:[%s2936_s27 + $0x7c] sm:$0xf] %vm875_vm0, %v1399_v38  ;;  %v1071_v40 = vadd.f32 %v2927_v7, %v1070_v39  ;;  %v1506_v7 = vld [vmem:[%s2936_s27 + $0x8] sm:$0xff] (%p2653_p5)  }
 0x176   : > { %1507 = vst [vmem:[%s1485_s22 + $0x8] sm:$0xff] (%p2653_p5), %v1506_v7  }
 0x177   : > { %v1119_v41 = vpop.f32.mrf.mxu3  ;;  %1527 = vst [vmem:[%s1485_s22 + $0x30] sm:$0xff] (%p2653_p5), %v1526_v46  }
 0x178   : > { %v1120_v42 = vadd.f32 %v1119_v41, %v1071_v40  ;;  %1478 = sbr.rel (!%p2653_p5) target bundleno = 389 (0x185), region = 56 }
 0x17a   : > { %v1367_v43 = vpack.c.bf16 %v1120_v42, %v1120_v42  ;;  %1433 = vst.msk [vmem:[%s2929_s23 + $0x78] sm:$0xff] %vm1417_vm1, %v1120_v42 }
 0x17c   : > { %1383 = vst.msk [vmem:[%s2936_s27 + $0x3c] sm:$0xf] %vm875_vm0, %v1367_v43  ;;  %v1562_v54 = vld [vmem:[%s2936_s27 + $0x78] sm:$0xff] (%p2653_p5)  }
 0x17d   : > { %1563 = vst [vmem:[%s1485_s22 + $0x238] sm:$0xff] %v1562_v54  }
 0x183   : > { %v1530_v47 = vld [vmem:[%s2936_s27 + $0x38] sm:$0xff]  }
 0x184   : > { %1531 = vst [vmem:[%s1485_s22 + $0x38] sm:$0xff] %v1530_v47  }
 0x185 PF: > { %1653 = sbr.rel (!%p2653_p5) target bundleno = 426 (0x1aa), region = 97  ;;  %s2353_s30 = sshll.u32 (%p2653_p5), %s2539_s11, 4  ;;  %v1751_v56 = vld [vmem:[%s2929_s23] sm:$0xff] (%p2653_p5)  ;;  %v1753_v35 = vld [vmem:[%s2929_s23 + $0x8] sm:$0xff] (%p2653_p5)  ;;  %v1755_v58 = vld [vmem:[%s2929_s23 + $0x10] sm:$0xff] (%p2653_p5) }
 0x186   : > { %s2354_s21 = sshll.u32 (%p2653_p5), %s2543_s12, 6  ;;  %v1757_v59 = vld [vmem:[%s2929_s23 + $0x18] sm:$0xff] (%p2653_p5)  ;;  %v1759_v60 = vld [vmem:[%s2929_s23 + $0x20] sm:$0xff] (%p2653_p5)  ;;  %v1761_v62 = vld [vmem:[%s2929_s23 + $0x28] sm:$0xff] (%p2653_p5) }
 0x187   : > { %s1658_s19 = sadd.s32 (%p2653_p5), %s2354_s21, %s2353_s30  ;;  %v1763_v63 = vld [vmem:[%s2929_s23 + $0x30] sm:$0xff] (%p2653_p5)  ;;  %v1765_v0 = vld [vmem:[%s2929_s23 + $0x38] sm:$0xff] (%p2653_p5)  ;;  %v1767_v1 = vld [vmem:[%s2929_s23 + $0x40] sm:$0xff] (%p2653_p5) }
 0x188   : > { %s2355_s27 = sshll.u32 (%p2653_p5), %s1658_s19, 3  ;;  %v1769_v2 = vld [vmem:[%s2929_s23 + $0x48] sm:$0xff] (%p2653_p5)  ;;  %v1771_v3 = vld [vmem:[%s2929_s23 + $0x50] sm:$0xff] (%p2653_p5)  ;;  %v1773_v4 = vld [vmem:[%s2929_s23 + $0x58] sm:$0xff] (%p2653_p5) }
 0x189   : > { %s3126_s29 = scalar_lea.vmem (%p2653_p5), %s3220_s9, %s2355_s27  ;;  %v1775_v5 = vld [vmem:[%s2929_s23 + $0x60] sm:$0xff] (%p2653_p5)  ;;  %v1777_v55 = vld [vmem:[%s2929_s23 + $0x68] sm:$0xff] (%p2653_p5)  ;;  %v1779_v6 = vld [vmem:[%s2929_s23 + $0x70] sm:$0xff] (%p2653_p5) }
 0x18a   : > { %1752 = vst [vmem:[%s3126_s29] sm:$0xff] %v1751_v56  ;;  %v1781_v26 = vld [vmem:[%s2929_s23 + $0x78] sm:$0xff]  ;;  %v1783_v57 = vld [vmem:[%s2929_s23 + $0x80] sm:$0xff]  ;;  %v1785_v8 = vld [vmem:[%s2929_s23 + $0x88] sm:$0xff] }
 0x18b   : > { %1754 = vst [vmem:[%s3126_s29 + $0x8] sm:$0xff] %v1753_v35  ;;  %v1787_v9 = vld [vmem:[%s2929_s23 + $0x90] sm:$0xff]  ;;  %v1789_v10 = vld [vmem:[%s2929_s23 + $0x98] sm:$0xff]  ;;  %v1791_v11 = vld [vmem:[%s2929_s23 + $0xa0] sm:$0xff] }
 0x18c   : > { %1756 = vst [vmem:[%s3126_s29 + $0x10] sm:$0xff] %v1755_v58  ;;  %v1793_v12 = vld [vmem:[%s2929_s23 + $0xa8] sm:$0xff]  ;;  %v1795_v13 = vld [vmem:[%s2929_s23 + $0xb0] sm:$0xff]  ;;  %v1797_v14 = vld [vmem:[%s2929_s23 + $0xb8] sm:$0xff] }
 0x18d   : > { %1758 = vst [vmem:[%s3126_s29 + $0x18] sm:$0xff] %v1757_v59  ;;  %v1799_v15 = vld [vmem:[%s2929_s23 + $0xc0] sm:$0xff]  ;;  %v1801_v16 = vld [vmem:[%s2929_s23 + $0xc8] sm:$0xff]  ;;  %v1803_v18 = vld [vmem:[%s2929_s23 + $0xd0] sm:$0xff] }
 0x18e   : > { %1760 = vst [vmem:[%s3126_s29 + $0x20] sm:$0xff] %v1759_v60  ;;  %v1805_v20 = vld [vmem:[%s2929_s23 + $0xd8] sm:$0xff]  ;;  %v1807_v21 = vld [vmem:[%s2929_s23 + $0xe0] sm:$0xff]  ;;  %v1809_v22 = vld [vmem:[%s2929_s23 + $0xe8] sm:$0xff] }
 0x18f   : > { %1762 = vst [vmem:[%s3126_s29 + $0x28] sm:$0xff] %v1761_v62  ;;  %v1811_v23 = vld [vmem:[%s2929_s23 + $0xf0] sm:$0xff]  ;;  %v1813_v24 = vld [vmem:[%s2929_s23 + $0xf8] sm:$0xff] }
 0x190   : > { %1764 = vst [vmem:[%s3126_s29 + $0x30] sm:$0xff] %v1763_v63 }
 0x191   : > { %1766 = vst [vmem:[%s3126_s29 + $0x38] sm:$0xff] %v1765_v0 }
 0x192   : > { %1768 = vst [vmem:[%s3126_s29 + $0x40] sm:$0xff] %v1767_v1 }
 0x193   : > { %1770 = vst [vmem:[%s3126_s29 + $0x48] sm:$0xff] %v1769_v2 }
 0x194   : > { %1772 = vst [vmem:[%s3126_s29 + $0x50] sm:$0xff] %v1771_v3 }
 0x195   : > { %1774 = vst [vmem:[%s3126_s29 + $0x58] sm:$0xff] %v1773_v4 }
 0x196   : > { %1776 = vst [vmem:[%s3126_s29 + $0x60] sm:$0xff] %v1775_v5 }
 0x197   : > { %1778 = vst [vmem:[%s3126_s29 + $0x68] sm:$0xff] %v1777_v55 }
 0x198   : > { %1780 = vst [vmem:[%s3126_s29 + $0x70] sm:$0xff] %v1779_v6 }
 0x199   : > { %1782 = vst [vmem:[%s3126_s29 + $0x78] sm:$0xff] %v1781_v26 }
 0x19a   : > { %1784 = vst [vmem:[%s3126_s29 + $0x400] sm:$0xff] %v1783_v57 }
 0x19b   : > { %1786 = vst [vmem:[%s3126_s29 + $0x408] sm:$0xff] %v1785_v8 }
 0x19c   : > { %1788 = vst [vmem:[%s3126_s29 + $0x410] sm:$0xff] %v1787_v9 }
 0x19d   : > { %1790 = vst [vmem:[%s3126_s29 + $0x418] sm:$0xff] %v1789_v10 }
 0x19e   : > { %1792 = vst [vmem:[%s3126_s29 + $0x420] sm:$0xff] %v1791_v11 }
 0x19f   : > { %1794 = vst [vmem:[%s3126_s29 + $0x428] sm:$0xff] %v1793_v12 }
 0x1a0   : > { %1796 = vst [vmem:[%s3126_s29 + $0x430] sm:$0xff] %v1795_v13 }
 0x1a1   : > { %1798 = vst [vmem:[%s3126_s29 + $0x438] sm:$0xff] %v1797_v14 }
 0x1a2   : > { %1800 = vst [vmem:[%s3126_s29 + $0x440] sm:$0xff] %v1799_v15 }
 0x1a3   : > { %1802 = vst [vmem:[%s3126_s29 + $0x448] sm:$0xff] %v1801_v16 }
 0x1a4   : > { %1804 = vst [vmem:[%s3126_s29 + $0x450] sm:$0xff] %v1803_v18 }
 0x1a5   : > { %1806 = vst [vmem:[%s3126_s29 + $0x458] sm:$0xff] %v1805_v20 }
 0x1a6   : > { %1808 = vst [vmem:[%s3126_s29 + $0x460] sm:$0xff] %v1807_v21 }
 0x1a7   : > { %1810 = vst [vmem:[%s3126_s29 + $0x468] sm:$0xff] %v1809_v22 }
 0x1a8   : > { %1812 = vst [vmem:[%s3126_s29 + $0x470] sm:$0xff] %v1811_v23 }
 0x1a9   : > { %1814 = vst [vmem:[%s3126_s29 + $0x478] sm:$0xff] %v1813_v24 }
 0x1aa PF: > { %s20_s15 = sadd.s32 1, %s2555_s15   ;;  %s3224_s30 = smov %s2535_s10 }
 0x1ab   : > { %p17_p11 = scmp.ge.s32.totalorder %s20_s15, 10   ;;  %s3225_s10 = smov %s2664_s24 }
 0x1ac   : > { %s3226_s11 = smov %s2547_s13  ;;  %s3227_s12 = smov %s2551_s14 }
 0x1ad   : > { %s3228_s13 = smov %s3231_s16  ;;  %s3229_s14 = smov %s3235_s17 }
 0x1ae   :  { %19 = sbr.rel (!%p17_p11) target bundleno = 6 (0x6), region = 201 }

</bundles_post_ra>
